<compile_context>
chip_gen: v7x
topology: tpu7x:2x2x1
jax: 0.10.0
libtpu: 0.0.40
codegen_flags: <defaults>
</compile_context>

<pallas_src>
import numpy as np

import jax
import jax.numpy as jnp
from jax.experimental import pallas as pl
from jax.experimental.pallas import tpu as pltpu


# ---------------------------------------------------------------------------
# Fused backbone + heads kernel (one invocation per image)
# ---------------------------------------------------------------------------

def _fused_detector_kernel(x_ref, w1_ref, b1_ref, w2_ref, b2_ref, wh_ref, bh_ref,
                           feat_ref, heads_ref, s_ref, fp_ref):
    """One image: conv1(3x3,s2) -> relu -> conv2(3x3,s2) -> relu -> fused heads(3x3,s1).

    x_ref:     (1, hq+1, wq+1, 16*Cin)  doubly space-to-depth'd, mean-subtracted image (bf16)
    w1_ref:    (16*Cin, Cs)             conv1 weights, taps stacked along K, 1/std folded (bf16)
    b1_ref:    (1, Cs)                  conv1 bias (f32)
    w2_ref:    (16*Cs, Cf)              conv2 (s2d-rewritten) weights, taps stacked along K (bf16)
    b2_ref:    (1, Cf)                  conv2 bias (f32)
    wh_ref:    (9*Cf, 128)              fused cls/reg/ctr head weights, taps stacked, lane-padded (bf16)
    bh_ref:    (1, 128)                 fused head bias (f32)
    feat_ref:  (1, hq*wq, Cf)           flattened feature map output (bf16)
    heads_ref: (1, hq*wq, 128)          flattened fused head output (bf16)
    s_ref:     VMEM (hq+1, wq+1, 4*Cs)  space-to-depth of the zero-padded stem (scratch)
    fp_ref:    VMEM (hq+2, wq+2, Cf)    zero-padded feature map (scratch)
    """
    hq = fp_ref.shape[0] - 2                     # output feature-map height (= H/4)
    wq = fp_ref.shape[1] - 2                     # output feature-map width  (= W/4)
    c = x_ref.shape[-1] // 4                     # channels per input parity block (= 4*Cin)
    cs = s_ref.shape[-1] // 4                    # stem channels

    # Halo'd scratches: zero, then only the interiors are written below, so the
    # borders act as the convs' zero padding.
    s_ref[...] = jnp.zeros_like(s_ref)
    fp_ref[...] = jnp.zeros_like(fp_ref)

    x = x_ref[0]                                 # (hq+1, wq+1, 4c)
    # parity blocks of the doubly-s2d input: (row parity, col parity) of the
    # once-s2d image -> channel blocks EE / EO / OE / OO.
    EE = slice(0 * c, 1 * c)
    EO = slice(1 * c, 2 * c)
    OE = slice(2 * c, 3 * c)
    OO = slice(3 * c, 4 * c)

    # ---- conv1: stride-2 3x3 conv, one matmul over all output pixels --------
    # Stem pixel (a, b) is grouped by parity (a%2, b%2); within a group the
    # four 2x2-tap inputs are contiguous slices of x, so the whole conv is a
    # single (4*hq*wq, 4c) x (4c, Cs) MXU matmul (taps stacked along K).
    rows = []
    for A in range(hq):                          # group EE: stem[2A, 2B]
        rows.append(x[A, 0:wq, :])
    for A in range(hq):                          # group EO: stem[2A, 2B+1]
        rows.append(jnp.concatenate(
            [x[A, 0:wq, EO], x[A, 1:wq + 1, EE],
             x[A, 0:wq, OO], x[A, 1:wq + 1, OE]], axis=-1))
    for A in range(hq):                          # group OE: stem[2A+1, 2B]
        rows.append(jnp.concatenate(
            [x[A, 0:wq, OE], x[A, 0:wq, OO],
             x[A + 1, 0:wq, EE], x[A + 1, 0:wq, EO]], axis=-1))
    for A in range(hq):                          # group OO: stem[2A+1, 2B+1]
        rows.append(jnp.concatenate(
            [x[A, 0:wq, OO], x[A, 1:wq + 1, OE],
             x[A + 1, 0:wq, EO], x[A + 1, 1:wq + 1, EE]], axis=-1))
    lhs1 = jnp.concatenate(rows, axis=0)                       # (4*hq*wq, 4c)
    stem = jnp.dot(lhs1, w1_ref[...], preferred_element_type=jnp.float32)
    stem = jnp.maximum(stem + b1_ref[...], 0.0).astype(s_ref.dtype)

    # Scatter the parity groups into the s2d'd zero-padded stem scratch so that
    # the stride-2 conv2 becomes a 2x2 VALID conv with contiguous taps.
    g = hq * wq
    for A in range(hq):
        r = A * wq
        s_ref[A,     0:wq,     3 * cs:4 * cs] = stem[0 * g + r:0 * g + r + wq, :]  # EE
        s_ref[A,     1:wq + 1, 2 * cs:3 * cs] = stem[1 * g + r:1 * g + r + wq, :]  # EO
        s_ref[A + 1, 0:wq,     1 * cs:2 * cs] = stem[2 * g + r:2 * g + r + wq, :]  # OE
        s_ref[A + 1, 1:wq + 1, 0 * cs:1 * cs] = stem[3 * g + r:3 * g + r + wq, :]  # OO

    # ---- conv2: stride-2 3x3 conv == 2x2 VALID conv on the s2d padded stem ---
    rows2 = []
    for e in range(hq):
        rows2.append(jnp.concatenate(
            [s_ref[e, 0:wq, :], s_ref[e, 1:wq + 1, :],
             s_ref[e + 1, 0:wq, :], s_ref[e + 1, 1:wq + 1, :]], axis=-1))
    lhs2 = jnp.concatenate(rows2, axis=0)                      # (hq*wq, 16*Cs)
    feat = jnp.dot(lhs2, w2_ref[...], preferred_element_type=jnp.float32)
    feat = jnp.maximum(feat + b2_ref[...], 0.0).astype(feat_ref.dtype)
    feat_ref[0] = feat                                         # bf16, lane = Cf
    for e in range(hq):
        fp_ref[e + 1, 1:wq + 1, :] = feat[e * wq:(e + 1) * wq, :]

    # ---- heads: cls / reg / ctr fused into one lane-dense 3x3 conv -----------
    rows3 = []
    for i in range(hq):
        taps = [fp_ref[i + di, dj:dj + wq, :] for di in range(3) for dj in range(3)]
        rows3.append(jnp.concatenate(taps, axis=-1))           # (wq, 9*Cf)
    lhs3 = jnp.concatenate(rows3, axis=0)                      # (hq*wq, 9*Cf)
    heads = jnp.dot(lhs3, wh_ref[...], preferred_element_type=jnp.float32)
    heads_ref[0] = (heads + bh_ref[...]).astype(heads_ref.dtype)


def _fused_forward_pallas(x_cat, w1, b1, w2, b2, wh, bh, *, hq, wq):
    """x_cat: (B, hq+1, wq+1, 16*Cin) bf16.  Returns (feat_flat, heads_flat)."""
    B = x_cat.shape[0]
    c_feat = w2.shape[-1]
    c_head = wh.shape[-1]
    c_stem = w1.shape[-1]
    return pl.pallas_call(
        _fused_detector_kernel,
        out_shape=(jax.ShapeDtypeStruct((B, hq * wq, c_feat), jnp.bfloat16),
                   jax.ShapeDtypeStruct((B, hq * wq, c_head), jnp.bfloat16)),
        grid=(B,),
        in_specs=[
            pl.BlockSpec((1,) + x_cat.shape[1:], lambda b: (b, 0, 0, 0)),
            pl.BlockSpec(w1.shape, lambda b: (0, 0)),
            pl.BlockSpec(b1.shape, lambda b: (0, 0)),
            pl.BlockSpec(w2.shape, lambda b: (0, 0)),
            pl.BlockSpec(b2.shape, lambda b: (0, 0)),
            pl.BlockSpec(wh.shape, lambda b: (0, 0)),
            pl.BlockSpec(bh.shape, lambda b: (0, 0)),
        ],
        out_specs=(
            pl.BlockSpec((1, hq * wq, c_feat), lambda b: (b, 0, 0)),
            pl.BlockSpec((1, hq * wq, c_head), lambda b: (b, 0, 0)),
        ),
        scratch_shapes=[
            pltpu.VMEM((hq + 1, wq + 1, 4 * c_stem), jnp.bfloat16),   # s2d padded stem
            pltpu.VMEM((hq + 2, wq + 2, c_feat), jnp.bfloat16),       # padded features
        ],
        compiler_params=pltpu.CompilerParams(
            dimension_semantics=("parallel",)),
    )(x_cat, w1, b1, w2, b2, wh, bh)


# ---------------------------------------------------------------------------
# Glue: space-to-depth reformulation of the stride-2 3x3 convs
# ---------------------------------------------------------------------------

def _space_to_depth(x):
    """(B, H, W, C) even H, W -> (B, H//2, W//2, 4C); channel order (r, s, c)."""
    B, H, W, C = x.shape
    x = x.reshape(B, H // 2, 2, W // 2, 2, C)
    x = jnp.transpose(x, (0, 1, 3, 2, 4, 5))
    return x.reshape(B, H // 2, W // 2, 4 * C)


def _s2d_conv_weight(w):
    """(3,3,Cin,Cout) stride-2/pad-1 conv weights -> (4, 4*Cin, Cout) tap-major
    weights of the equivalent 2x2 VALID conv on the s2d'd zero-padded input."""
    cin, cout = w.shape[2], w.shape[3]
    w = jnp.pad(w, ((0, 1), (0, 1), (0, 0), (0, 0)))   # (4,4,Cin,Cout)
    w = w.reshape(2, 2, 2, 2, cin, cout)               # (p1, p0, q1, q0, c, o)
    w = jnp.transpose(w, (0, 2, 1, 3, 4, 5))           # (p1, q1, p0, q0, c, o)
    return w.reshape(4, 4 * cin, cout)                 # tap = 2*p1+q1, chan = (2*p0+q0)*Cin+c


# ---------------------------------------------------------------------------
# OneStageDetector (synthetic backbone + FCOS-like proposal head)
# ---------------------------------------------------------------------------

def init_params(key, cin=3, stem=16, feat=32, num_classes=8):
    ks = jax.random.split(key, 10)
    p = {}
    s = 0.05
    p["conv1_w"] = s * jax.random.normal(ks[0], (3, 3, cin, stem), jnp.float32)
    p["conv1_b"] = jnp.zeros((stem,), jnp.float32)
    p["conv2_w"] = s * jax.random.normal(ks[1], (3, 3, stem, feat), jnp.float32)
    p["conv2_b"] = jnp.zeros((feat,), jnp.float32)
    p["cls_w"] = s * jax.random.normal(ks[2], (3, 3, feat, num_classes), jnp.float32)
    p["cls_b"] = jnp.full((num_classes,), -2.0, jnp.float32)  # FCOS-style prior bias
    p["reg_w"] = s * jax.random.normal(ks[3], (3, 3, feat, 4), jnp.float32)
    p["reg_b"] = jnp.zeros((4,), jnp.float32)
    p["ctr_w"] = s * jax.random.normal(ks[4], (3, 3, feat, 1), jnp.float32)
    p["ctr_b"] = jnp.zeros((1,), jnp.float32)
    p["pixel_mean"] = jnp.array([103.53, 116.28, 123.675], jnp.float32)  # detectron2 default
    p["pixel_std"] = jnp.array([57.375, 57.12, 58.395], jnp.float32)
    return p


def one_stage_detector_forward(params, images_nchw):
    """Forward pass (inference, output_raw=True path).

    images_nchw: (B, C, H, W) float32 (PyTorch layout).  Returns raw predictions
    in NCHW to mirror the torch module.
    """
    num_classes = params["cls_b"].shape[0]
    B, C, H, W = images_nchw.shape
    assert H % 4 == 0 and W % 4 == 0, "stride-2 x stride-2 backbone needs H, W divisible by 4"
    hq, wq = H // 4, W // 4

    # ---- glue: normalize + double space-to-depth (single fused XLA gather pass)
    # Normalization fold: conv(w, (x-mean)/std) == conv(w/std, x-mean).
    x = jnp.transpose(images_nchw, (0, 2, 3, 1)) - params["pixel_mean"]   # NHWC, mean-subtracted
    x = jnp.pad(x, ((0, 0), (1, 1), (1, 1), (0, 0)))                      # conv1's pad=1
    xs = _space_to_depth(x)                                               # (B, H/2+1, W/2+1, 4C)
    xs = jnp.pad(xs, ((0, 0), (0, 1), (0, 1), (0, 0)))                    # even dims for 2nd s2d (pad never read)
    x_cat = _space_to_depth(xs).astype(jnp.bfloat16)                      # (B, hq+1, wq+1, 16C)

    # ---- weights: s2d-rewrite the stride-2 convs, stack taps along K, bf16 ----
    w1 = _s2d_conv_weight(params["conv1_w"] / params["pixel_std"][None, None, :, None])
    w1 = w1.reshape(-1, w1.shape[-1]).astype(jnp.bfloat16)                # (16*C, 16)
    b1 = params["conv1_b"].reshape(1, -1)
    w2 = _s2d_conv_weight(params["conv2_w"])
    w2 = w2.reshape(-1, w2.shape[-1]).astype(jnp.bfloat16)                # (256, 32)
    b2 = params["conv2_b"].reshape(1, -1)

    HEAD_PAD = 128                                                        # lane-dense head store
    wh = jnp.concatenate([params["cls_w"], params["reg_w"], params["ctr_w"]], axis=-1)
    n_head = wh.shape[-1]                                                 # num_classes + 4 + 1
    wh = jnp.pad(wh, ((0, 0), (0, 0), (0, 0), (0, HEAD_PAD - n_head)))
    wh = wh.reshape(-1, HEAD_PAD).astype(jnp.bfloat16)                    # (288, 128)
    bh = jnp.concatenate([params["cls_b"], params["reg_b"], params["ctr_b"]])
    bh = jnp.pad(bh, (0, HEAD_PAD - n_head)).reshape(1, HEAD_PAD)

    feat_flat, heads_flat = _fused_forward_pallas(x_cat, w1, b1, w2, b2, wh, bh, hq=hq, wq=wq)

    feat = feat_flat.reshape(B, hq, wq, -1)                               # bf16 features
    heads = heads_flat.reshape(B, hq, wq, HEAD_PAD).astype(jnp.float32)
    cls_logits = heads[..., :num_classes]
    bbox_reg = heads[..., num_classes:num_classes + 4]
    ctrness = heads[..., num_classes + 4:num_classes + 5]

    # TODO(synk): proposal_generator NMS / Instances construction / bezier
    # clamping in detector_postprocess is data-dependent host-style logic with
    # no clean Pallas equivalent; raw predictions are returned instead.
    to_nchw = lambda t: jnp.transpose(t, (0, 3, 1, 2))
    return {
        "features": to_nchw(feat),                  # bf16 (no extra f32 HBM pass)
        "cls_logits": to_nchw(cls_logits),
        "bbox_reg": to_nchw(bbox_reg),
        "ctrness": to_nchw(ctrness),
    }


# ---------------------------------------------------------------------------
# Pure-JAX f32 reference (tolerance check requested by the review)
# ---------------------------------------------------------------------------

def _reference_forward(params, images_nchw):
    x = jnp.transpose(images_nchw, (0, 2, 3, 1))
    x = (x - params["pixel_mean"]) / params["pixel_std"]

    def conv(h, w, b, stride, relu):
        y = jax.lax.conv_general_dilated(
            h, w, window_strides=(stride, stride), padding=((1, 1), (1, 1)),
            dimension_numbers=("NHWC", "HWIO", "NHWC"))
        y = y + b
        return jnp.maximum(y, 0.0) if relu else y

    stem = conv(x, params["conv1_w"], params["conv1_b"], 2, True)
    feat = conv(stem, params["conv2_w"], params["conv2_b"], 2, True)
    cls = conv(feat, params["cls_w"], params["cls_b"], 1, False)
    reg = conv(feat, params["reg_w"], params["reg_b"], 1, False)
    ctr = conv(feat, params["ctr_w"], params["ctr_b"], 1, False)
    to_nchw = lambda t: jnp.transpose(t, (0, 3, 1, 2))
    return {"features": to_nchw(feat), "cls_logits": to_nchw(cls),
            "bbox_reg": to_nchw(reg), "ctrness": to_nchw(ctr)}


if __name__ == "__main__":
    key = jax.random.PRNGKey(0)
    pkey, xkey = jax.random.split(key)
    params = init_params(pkey)

    # small image batch, PyTorch NCHW convention: (B=2, C=3, H=16, W=16)
    images = 255.0 * jax.random.uniform(xkey, (2, 3, 16, 16), jnp.float32)

    out = jax.jit(one_stage_detector_forward)(params, images)
    jax.block_until_ready(out)

    assert out["features"].shape == (2, 32, 4, 4)
    assert out["cls_logits"].shape == (2, 8, 4, 4)
    assert out["bbox_reg"].shape == (2, 4, 4, 4)
    assert out["ctrness"].shape == (2, 1, 4, 4)

    # Loose-tolerance correctness check: kernel computes in bf16, reference in f32.
    ref = jax.jit(_reference_forward)(params, images)
    for k in ("features", "cls_logits", "bbox_reg", "ctrness"):
        np.testing.assert_allclose(
            np.asarray(out[k].astype(jnp.float32)), np.asarray(ref[k]),
            atol=0.2, rtol=0.1)

    print("KERNEL_OK")
</pallas_src>

<mosaic_0001>
module attributes {stable_mosaic.version = 11 : i64} {
  func.func @_fused_detector_kernel(%arg0: i32, %arg1: memref<1x5x5x48xbf16, #tpu.memory_space<vmem>>, %arg2: memref<48x16xbf16, #tpu.memory_space<vmem>>, %arg3: memref<1x16xf32, #tpu.memory_space<vmem>>, %arg4: memref<256x32xbf16, #tpu.memory_space<vmem>>, %arg5: memref<1x32xf32, #tpu.memory_space<vmem>>, %arg6: memref<288x128xbf16, #tpu.memory_space<vmem>>, %arg7: memref<1x128xf32, #tpu.memory_space<vmem>>, %arg8: memref<1x16x32xbf16, #tpu.memory_space<vmem>>, %arg9: memref<1x16x128xbf16, #tpu.memory_space<vmem>>, %arg10: memref<5x5x64xbf16, #tpu.memory_space<vmem>>, %arg11: memref<6x6x32xbf16, #tpu.memory_space<vmem>>) attributes {dimension_semantics = [#tpu.dimension_semantics<parallel>], iteration_bounds = array<i64: 2>, scalar_prefetch = 0 : i64, scratch_operands = 2 : i64, tpu.core_type = #tpu.core_type<tc>, window_params = [{transform_indices = @transform_0, window_bounds = array<i64: 1, 5, 5, 48>}, {pipeline_mode = #tpu.pipeline_mode<synchronous>, transform_indices = @transform_1, window_bounds = array<i64: 48, 16>}, {pipeline_mode = #tpu.pipeline_mode<synchronous>, transform_indices = @transform_2, window_bounds = array<i64: 1, 16>}, {pipeline_mode = #tpu.pipeline_mode<synchronous>, transform_indices = @transform_3, window_bounds = array<i64: 256, 32>}, {pipeline_mode = #tpu.pipeline_mode<synchronous>, transform_indices = @transform_4, window_bounds = array<i64: 1, 32>}, {pipeline_mode = #tpu.pipeline_mode<synchronous>, transform_indices = @transform_5, window_bounds = array<i64: 288, 128>}, {pipeline_mode = #tpu.pipeline_mode<synchronous>, transform_indices = @transform_6, window_bounds = array<i64: 1, 128>}, {transform_indices = @transform_7, window_bounds = array<i64: 1, 16, 32>}, {transform_indices = @transform_8, window_bounds = array<i64: 1, 16, 128>}]} {
    %cst = arith.constant 0.000000e+00 : bf16
    %0 = vector.broadcast %cst : bf16 to vector<5x5x64xbf16>
    %c0 = arith.constant 0 : index
    %c0_0 = arith.constant 0 : index
    %c0_1 = arith.constant 0 : index
    %1 = vector.load %arg10[%c0, %c0_0, %c0_1] : memref<5x5x64xbf16, #tpu.memory_space<vmem>>, vector<5x5x64xbf16>
    tpu.vector_store %arg10[%c0, %c0_0, %c0_1], %0 {strides = array<i32>} : memref<5x5x64xbf16, #tpu.memory_space<vmem>>, vector<5x5x64xbf16>,
    %cst_2 = arith.constant 0.000000e+00 : bf16
    %2 = vector.broadcast %cst_2 : bf16 to vector<6x6x32xbf16>
    %c0_3 = arith.constant 0 : index
    %c0_4 = arith.constant 0 : index
    %c0_5 = arith.constant 0 : index
    %3 = vector.load %arg11[%c0_3, %c0_4, %c0_5] : memref<6x6x32xbf16, #tpu.memory_space<vmem>>, vector<6x6x32xbf16>
    tpu.vector_store %arg11[%c0_3, %c0_4, %c0_5], %2 {strides = array<i32>} : memref<6x6x32xbf16, #tpu.memory_space<vmem>>, vector<6x6x32xbf16>,
    %c0_6 = arith.constant 0 : index
    %c0_7 = arith.constant 0 : index
    %c0_8 = arith.constant 0 : index
    %c0_9 = arith.constant 0 : index
    %4 = vector.load %arg1[%c0_6, %c0_7, %c0_8, %c0_9] : memref<1x5x5x48xbf16, #tpu.memory_space<vmem>>, vector<1x5x5x48xbf16>
    %5 = vector.shape_cast %4 : vector<1x5x5x48xbf16> to vector<5x5x48xbf16>
    %6 = vector.extract_strided_slice %5 {offsets = [0, 0, 0], sizes = [1, 4, 48], strides = [1, 1, 1]} : vector<5x5x48xbf16> to vector<1x4x48xbf16>
    %7 = vector.shape_cast %6 : vector<1x4x48xbf16> to vector<4x48xbf16>
    %8 = vector.extract_strided_slice %5 {offsets = [1, 0, 0], sizes = [1, 4, 48], strides = [1, 1, 1]} : vector<5x5x48xbf16> to vector<1x4x48xbf16>
    %9 = vector.shape_cast %8 : vector<1x4x48xbf16> to vector<4x48xbf16>
    %10 = vector.extract_strided_slice %5 {offsets = [2, 0, 0], sizes = [1, 4, 48], strides = [1, 1, 1]} : vector<5x5x48xbf16> to vector<1x4x48xbf16>
    %11 = vector.shape_cast %10 : vector<1x4x48xbf16> to vector<4x48xbf16>
    %12 = vector.extract_strided_slice %5 {offsets = [3, 0, 0], sizes = [1, 4, 48], strides = [1, 1, 1]} : vector<5x5x48xbf16> to vector<1x4x48xbf16>
    %13 = vector.shape_cast %12 : vector<1x4x48xbf16> to vector<4x48xbf16>
    %14 = vector.extract_strided_slice %5 {offsets = [0, 0, 12], sizes = [1, 4, 12], strides = [1, 1, 1]} : vector<5x5x48xbf16> to vector<1x4x12xbf16>
    %15 = vector.shape_cast %14 : vector<1x4x12xbf16> to vector<4x12xbf16>
    %16 = vector.extract_strided_slice %5 {offsets = [0, 1, 0], sizes = [1, 4, 12], strides = [1, 1, 1]} : vector<5x5x48xbf16> to vector<1x4x12xbf16>
    %17 = vector.shape_cast %16 : vector<1x4x12xbf16> to vector<4x12xbf16>
    %18 = vector.extract_strided_slice %5 {offsets = [0, 0, 36], sizes = [1, 4, 12], strides = [1, 1, 1]} : vector<5x5x48xbf16> to vector<1x4x12xbf16>
    %19 = vector.shape_cast %18 : vector<1x4x12xbf16> to vector<4x12xbf16>
    %20 = vector.extract_strided_slice %5 {offsets = [0, 1, 24], sizes = [1, 4, 12], strides = [1, 1, 1]} : vector<5x5x48xbf16> to vector<1x4x12xbf16>
    %21 = vector.shape_cast %20 : vector<1x4x12xbf16> to vector<4x12xbf16>
    %22 = tpu.concatenate %15, %17, %19, %21 in 1 : vector<4x12xbf16>, vector<4x12xbf16>, vector<4x12xbf16>, vector<4x12xbf16> -> vector<4x48xbf16>
    %23 = vector.extract_strided_slice %5 {offsets = [1, 0, 12], sizes = [1, 4, 12], strides = [1, 1, 1]} : vector<5x5x48xbf16> to vector<1x4x12xbf16>
    %24 = vector.shape_cast %23 : vector<1x4x12xbf16> to vector<4x12xbf16>
    %25 = vector.extract_strided_slice %5 {offsets = [1, 1, 0], sizes = [1, 4, 12], strides = [1, 1, 1]} : vector<5x5x48xbf16> to vector<1x4x12xbf16>
    %26 = vector.shape_cast %25 : vector<1x4x12xbf16> to vector<4x12xbf16>
    %27 = vector.extract_strided_slice %5 {offsets = [1, 0, 36], sizes = [1, 4, 12], strides = [1, 1, 1]} : vector<5x5x48xbf16> to vector<1x4x12xbf16>
    %28 = vector.shape_cast %27 : vector<1x4x12xbf16> to vector<4x12xbf16>
    %29 = vector.extract_strided_slice %5 {offsets = [1, 1, 24], sizes = [1, 4, 12], strides = [1, 1, 1]} : vector<5x5x48xbf16> to vector<1x4x12xbf16>
    %30 = vector.shape_cast %29 : vector<1x4x12xbf16> to vector<4x12xbf16>
    %31 = tpu.concatenate %24, %26, %28, %30 in 1 : vector<4x12xbf16>, vector<4x12xbf16>, vector<4x12xbf16>, vector<4x12xbf16> -> vector<4x48xbf16>
    %32 = vector.extract_strided_slice %5 {offsets = [2, 0, 12], sizes = [1, 4, 12], strides = [1, 1, 1]} : vector<5x5x48xbf16> to vector<1x4x12xbf16>
    %33 = vector.shape_cast %32 : vector<1x4x12xbf16> to vector<4x12xbf16>
    %34 = vector.extract_strided_slice %5 {offsets = [2, 1, 0], sizes = [1, 4, 12], strides = [1, 1, 1]} : vector<5x5x48xbf16> to vector<1x4x12xbf16>
    %35 = vector.shape_cast %34 : vector<1x4x12xbf16> to vector<4x12xbf16>
    %36 = vector.extract_strided_slice %5 {offsets = [2, 0, 36], sizes = [1, 4, 12], strides = [1, 1, 1]} : vector<5x5x48xbf16> to vector<1x4x12xbf16>
    %37 = vector.shape_cast %36 : vector<1x4x12xbf16> to vector<4x12xbf16>
    %38 = vector.extract_strided_slice %5 {offsets = [2, 1, 24], sizes = [1, 4, 12], strides = [1, 1, 1]} : vector<5x5x48xbf16> to vector<1x4x12xbf16>
    %39 = vector.shape_cast %38 : vector<1x4x12xbf16> to vector<4x12xbf16>
    %40 = tpu.concatenate %33, %35, %37, %39 in 1 : vector<4x12xbf16>, vector<4x12xbf16>, vector<4x12xbf16>, vector<4x12xbf16> -> vector<4x48xbf16>
    %41 = vector.extract_strided_slice %5 {offsets = [3, 0, 12], sizes = [1, 4, 12], strides = [1, 1, 1]} : vector<5x5x48xbf16> to vector<1x4x12xbf16>
    %42 = vector.shape_cast %41 : vector<1x4x12xbf16> to vector<4x12xbf16>
    %43 = vector.extract_strided_slice %5 {offsets = [3, 1, 0], sizes = [1, 4, 12], strides = [1, 1, 1]} : vector<5x5x48xbf16> to vector<1x4x12xbf16>
    %44 = vector.shape_cast %43 : vector<1x4x12xbf16> to vector<4x12xbf16>
    %45 = vector.extract_strided_slice %5 {offsets = [3, 0, 36], sizes = [1, 4, 12], strides = [1, 1, 1]} : vector<5x5x48xbf16> to vector<1x4x12xbf16>
    %46 = vector.shape_cast %45 : vector<1x4x12xbf16> to vector<4x12xbf16>
    %47 = vector.extract_strided_slice %5 {offsets = [3, 1, 24], sizes = [1, 4, 12], strides = [1, 1, 1]} : vector<5x5x48xbf16> to vector<1x4x12xbf16>
    %48 = vector.shape_cast %47 : vector<1x4x12xbf16> to vector<4x12xbf16>
    %49 = tpu.concatenate %42, %44, %46, %48 in 1 : vector<4x12xbf16>, vector<4x12xbf16>, vector<4x12xbf16>, vector<4x12xbf16> -> vector<4x48xbf16>
    %50 = vector.extract_strided_slice %5 {offsets = [0, 0, 24], sizes = [1, 4, 12], strides = [1, 1, 1]} : vector<5x5x48xbf16> to vector<1x4x12xbf16>
    %51 = vector.shape_cast %50 : vector<1x4x12xbf16> to vector<4x12xbf16>
    %52 = vector.extract_strided_slice %5 {offsets = [0, 0, 36], sizes = [1, 4, 12], strides = [1, 1, 1]} : vector<5x5x48xbf16> to vector<1x4x12xbf16>
    %53 = vector.shape_cast %52 : vector<1x4x12xbf16> to vector<4x12xbf16>
    %54 = vector.extract_strided_slice %5 {offsets = [1, 0, 0], sizes = [1, 4, 12], strides = [1, 1, 1]} : vector<5x5x48xbf16> to vector<1x4x12xbf16>
    %55 = vector.shape_cast %54 : vector<1x4x12xbf16> to vector<4x12xbf16>
    %56 = vector.extract_strided_slice %5 {offsets = [1, 0, 12], sizes = [1, 4, 12], strides = [1, 1, 1]} : vector<5x5x48xbf16> to vector<1x4x12xbf16>
    %57 = vector.shape_cast %56 : vector<1x4x12xbf16> to vector<4x12xbf16>
    %58 = tpu.concatenate %51, %53, %55, %57 in 1 : vector<4x12xbf16>, vector<4x12xbf16>, vector<4x12xbf16>, vector<4x12xbf16> -> vector<4x48xbf16>
    %59 = vector.extract_strided_slice %5 {offsets = [1, 0, 24], sizes = [1, 4, 12], strides = [1, 1, 1]} : vector<5x5x48xbf16> to vector<1x4x12xbf16>
    %60 = vector.shape_cast %59 : vector<1x4x12xbf16> to vector<4x12xbf16>
    %61 = vector.extract_strided_slice %5 {offsets = [1, 0, 36], sizes = [1, 4, 12], strides = [1, 1, 1]} : vector<5x5x48xbf16> to vector<1x4x12xbf16>
    %62 = vector.shape_cast %61 : vector<1x4x12xbf16> to vector<4x12xbf16>
    %63 = vector.extract_strided_slice %5 {offsets = [2, 0, 0], sizes = [1, 4, 12], strides = [1, 1, 1]} : vector<5x5x48xbf16> to vector<1x4x12xbf16>
    %64 = vector.shape_cast %63 : vector<1x4x12xbf16> to vector<4x12xbf16>
    %65 = vector.extract_strided_slice %5 {offsets = [2, 0, 12], sizes = [1, 4, 12], strides = [1, 1, 1]} : vector<5x5x48xbf16> to vector<1x4x12xbf16>
    %66 = vector.shape_cast %65 : vector<1x4x12xbf16> to vector<4x12xbf16>
    %67 = tpu.concatenate %60, %62, %64, %66 in 1 : vector<4x12xbf16>, vector<4x12xbf16>, vector<4x12xbf16>, vector<4x12xbf16> -> vector<4x48xbf16>
    %68 = vector.extract_strided_slice %5 {offsets = [2, 0, 24], sizes = [1, 4, 12], strides = [1, 1, 1]} : vector<5x5x48xbf16> to vector<1x4x12xbf16>
    %69 = vector.shape_cast %68 : vector<1x4x12xbf16> to vector<4x12xbf16>
    %70 = vector.extract_strided_slice %5 {offsets = [2, 0, 36], sizes = [1, 4, 12], strides = [1, 1, 1]} : vector<5x5x48xbf16> to vector<1x4x12xbf16>
    %71 = vector.shape_cast %70 : vector<1x4x12xbf16> to vector<4x12xbf16>
    %72 = vector.extract_strided_slice %5 {offsets = [3, 0, 0], sizes = [1, 4, 12], strides = [1, 1, 1]} : vector<5x5x48xbf16> to vector<1x4x12xbf16>
    %73 = vector.shape_cast %72 : vector<1x4x12xbf16> to vector<4x12xbf16>
    %74 = vector.extract_strided_slice %5 {offsets = [3, 0, 12], sizes = [1, 4, 12], strides = [1, 1, 1]} : vector<5x5x48xbf16> to vector<1x4x12xbf16>
    %75 = vector.shape_cast %74 : vector<1x4x12xbf16> to vector<4x12xbf16>
    %76 = tpu.concatenate %69, %71, %73, %75 in 1 : vector<4x12xbf16>, vector<4x12xbf16>, vector<4x12xbf16>, vector<4x12xbf16> -> vector<4x48xbf16>
    %77 = vector.extract_strided_slice %5 {offsets = [3, 0, 24], sizes = [1, 4, 12], strides = [1, 1, 1]} : vector<5x5x48xbf16> to vector<1x4x12xbf16>
    %78 = vector.shape_cast %77 : vector<1x4x12xbf16> to vector<4x12xbf16>
    %79 = vector.extract_strided_slice %5 {offsets = [3, 0, 36], sizes = [1, 4, 12], strides = [1, 1, 1]} : vector<5x5x48xbf16> to vector<1x4x12xbf16>
    %80 = vector.shape_cast %79 : vector<1x4x12xbf16> to vector<4x12xbf16>
    %81 = vector.extract_strided_slice %5 {offsets = [4, 0, 0], sizes = [1, 4, 12], strides = [1, 1, 1]} : vector<5x5x48xbf16> to vector<1x4x12xbf16>
    %82 = vector.shape_cast %81 : vector<1x4x12xbf16> to vector<4x12xbf16>
    %83 = vector.extract_strided_slice %5 {offsets = [4, 0, 12], sizes = [1, 4, 12], strides = [1, 1, 1]} : vector<5x5x48xbf16> to vector<1x4x12xbf16>
    %84 = vector.shape_cast %83 : vector<1x4x12xbf16> to vector<4x12xbf16>
    %85 = tpu.concatenate %78, %80, %82, %84 in 1 : vector<4x12xbf16>, vector<4x12xbf16>, vector<4x12xbf16>, vector<4x12xbf16> -> vector<4x48xbf16>
    %86 = vector.extract_strided_slice %5 {offsets = [0, 0, 36], sizes = [1, 4, 12], strides = [1, 1, 1]} : vector<5x5x48xbf16> to vector<1x4x12xbf16>
    %87 = vector.shape_cast %86 : vector<1x4x12xbf16> to vector<4x12xbf16>
    %88 = vector.extract_strided_slice %5 {offsets = [0, 1, 24], sizes = [1, 4, 12], strides = [1, 1, 1]} : vector<5x5x48xbf16> to vector<1x4x12xbf16>
    %89 = vector.shape_cast %88 : vector<1x4x12xbf16> to vector<4x12xbf16>
    %90 = vector.extract_strided_slice %5 {offsets = [1, 0, 12], sizes = [1, 4, 12], strides = [1, 1, 1]} : vector<5x5x48xbf16> to vector<1x4x12xbf16>
    %91 = vector.shape_cast %90 : vector<1x4x12xbf16> to vector<4x12xbf16>
    %92 = vector.extract_strided_slice %5 {offsets = [1, 1, 0], sizes = [1, 4, 12], strides = [1, 1, 1]} : vector<5x5x48xbf16> to vector<1x4x12xbf16>
    %93 = vector.shape_cast %92 : vector<1x4x12xbf16> to vector<4x12xbf16>
    %94 = tpu.concatenate %87, %89, %91, %93 in 1 : vector<4x12xbf16>, vector<4x12xbf16>, vector<4x12xbf16>, vector<4x12xbf16> -> vector<4x48xbf16>
    %95 = vector.extract_strided_slice %5 {offsets = [1, 0, 36], sizes = [1, 4, 12], strides = [1, 1, 1]} : vector<5x5x48xbf16> to vector<1x4x12xbf16>
    %96 = vector.shape_cast %95 : vector<1x4x12xbf16> to vector<4x12xbf16>
    %97 = vector.extract_strided_slice %5 {offsets = [1, 1, 24], sizes = [1, 4, 12], strides = [1, 1, 1]} : vector<5x5x48xbf16> to vector<1x4x12xbf16>
    %98 = vector.shape_cast %97 : vector<1x4x12xbf16> to vector<4x12xbf16>
    %99 = vector.extract_strided_slice %5 {offsets = [2, 0, 12], sizes = [1, 4, 12], strides = [1, 1, 1]} : vector<5x5x48xbf16> to vector<1x4x12xbf16>
    %100 = vector.shape_cast %99 : vector<1x4x12xbf16> to vector<4x12xbf16>
    %101 = vector.extract_strided_slice %5 {offsets = [2, 1, 0], sizes = [1, 4, 12], strides = [1, 1, 1]} : vector<5x5x48xbf16> to vector<1x4x12xbf16>
    %102 = vector.shape_cast %101 : vector<1x4x12xbf16> to vector<4x12xbf16>
    %103 = tpu.concatenate %96, %98, %100, %102 in 1 : vector<4x12xbf16>, vector<4x12xbf16>, vector<4x12xbf16>, vector<4x12xbf16> -> vector<4x48xbf16>
    %104 = vector.extract_strided_slice %5 {offsets = [2, 0, 36], sizes = [1, 4, 12], strides = [1, 1, 1]} : vector<5x5x48xbf16> to vector<1x4x12xbf16>
    %105 = vector.shape_cast %104 : vector<1x4x12xbf16> to vector<4x12xbf16>
    %106 = vector.extract_strided_slice %5 {offsets = [2, 1, 24], sizes = [1, 4, 12], strides = [1, 1, 1]} : vector<5x5x48xbf16> to vector<1x4x12xbf16>
    %107 = vector.shape_cast %106 : vector<1x4x12xbf16> to vector<4x12xbf16>
    %108 = vector.extract_strided_slice %5 {offsets = [3, 0, 12], sizes = [1, 4, 12], strides = [1, 1, 1]} : vector<5x5x48xbf16> to vector<1x4x12xbf16>
    %109 = vector.shape_cast %108 : vector<1x4x12xbf16> to vector<4x12xbf16>
    %110 = vector.extract_strided_slice %5 {offsets = [3, 1, 0], sizes = [1, 4, 12], strides = [1, 1, 1]} : vector<5x5x48xbf16> to vector<1x4x12xbf16>
    %111 = vector.shape_cast %110 : vector<1x4x12xbf16> to vector<4x12xbf16>
    %112 = tpu.concatenate %105, %107, %109, %111 in 1 : vector<4x12xbf16>, vector<4x12xbf16>, vector<4x12xbf16>, vector<4x12xbf16> -> vector<4x48xbf16>
    %113 = vector.extract_strided_slice %5 {offsets = [3, 0, 36], sizes = [1, 4, 12], strides = [1, 1, 1]} : vector<5x5x48xbf16> to vector<1x4x12xbf16>
    %114 = vector.shape_cast %113 : vector<1x4x12xbf16> to vector<4x12xbf16>
    %115 = vector.extract_strided_slice %5 {offsets = [3, 1, 24], sizes = [1, 4, 12], strides = [1, 1, 1]} : vector<5x5x48xbf16> to vector<1x4x12xbf16>
    %116 = vector.shape_cast %115 : vector<1x4x12xbf16> to vector<4x12xbf16>
    %117 = vector.extract_strided_slice %5 {offsets = [4, 0, 12], sizes = [1, 4, 12], strides = [1, 1, 1]} : vector<5x5x48xbf16> to vector<1x4x12xbf16>
    %118 = vector.shape_cast %117 : vector<1x4x12xbf16> to vector<4x12xbf16>
    %119 = vector.extract_strided_slice %5 {offsets = [4, 1, 0], sizes = [1, 4, 12], strides = [1, 1, 1]} : vector<5x5x48xbf16> to vector<1x4x12xbf16>
    %120 = vector.shape_cast %119 : vector<1x4x12xbf16> to vector<4x12xbf16>
    %121 = tpu.concatenate %114, %116, %118, %120 in 1 : vector<4x12xbf16>, vector<4x12xbf16>, vector<4x12xbf16>, vector<4x12xbf16> -> vector<4x48xbf16>
    %122 = tpu.concatenate %7, %9, %11, %13, %22, %31, %40, %49, %58, %67, %76, %85, %94, %103, %112, %121 in 0 : vector<4x48xbf16>, vector<4x48xbf16>, vector<4x48xbf16>, vector<4x48xbf16>, vector<4x48xbf16>, vector<4x48xbf16>, vector<4x48xbf16>, vector<4x48xbf16>, vector<4x48xbf16>, vector<4x48xbf16>, vector<4x48xbf16>, vector<4x48xbf16>, vector<4x48xbf16>, vector<4x48xbf16>, vector<4x48xbf16>, vector<4x48xbf16> -> vector<64x48xbf16>
    %c0_10 = arith.constant 0 : index
    %c0_11 = arith.constant 0 : index
    %123 = vector.load %arg2[%c0_10, %c0_11] : memref<48x16xbf16, #tpu.memory_space<vmem>>, vector<48x16xbf16>
    %cst_12 = arith.constant dense<0.000000e+00> : vector<64x16xf32>
    %124 = tpu.matmul %122, %123, %cst_12 {dimension_numbers = #tpu.dot_dimension_numbers<[1], [0], [0], [1], [0, 0, 1, 1], [], []>} : vector<64x48xbf16>, vector<48x16xbf16>, vector<64x16xf32> -> vector<64x16xf32>
    %c0_13 = arith.constant 0 : index
    %c0_14 = arith.constant 0 : index
    %125 = vector.load %arg3[%c0_13, %c0_14] : memref<1x16xf32, #tpu.memory_space<vmem>>, vector<1x16xf32>
    %126 = vector.broadcast %125 : vector<1x16xf32> to vector<64x16xf32>
    %127 = arith.addf %124, %126 : vector<64x16xf32>
    %cst_15 = arith.constant 0.000000e+00 : f32
    %128 = vector.broadcast %cst_15 : f32 to vector<64x16xf32>
    %129 = arith.maximumf %127, %128 : vector<64x16xf32>
    %130 = arith.truncf %129 : vector<64x16xf32> to vector<64x16xbf16>
    %131 = vector.extract_strided_slice %130 {offsets = [0, 0], sizes = [4, 16], strides = [1, 1]} : vector<64x16xbf16> to vector<4x16xbf16>
    %c0_16 = arith.constant 0 : index
    %c0_17 = arith.constant 0 : index
    %c48 = arith.constant 48 : index
    %132 = vector.load %arg10[%c0_16, %c0_17, %c48] : memref<5x5x64xbf16, #tpu.memory_space<vmem>>, vector<1x4x16xbf16>
    %133 = vector.shape_cast %132 : vector<1x4x16xbf16> to vector<4x16xbf16>
    %134 = vector.shape_cast %131 : vector<4x16xbf16> to vector<1x4x16xbf16>
    tpu.vector_store %arg10[%c0_16, %c0_17, %c48], %134 {strides = array<i32>} : memref<5x5x64xbf16, #tpu.memory_space<vmem>>, vector<1x4x16xbf16>,
    %135 = vector.extract_strided_slice %130 {offsets = [16, 0], sizes = [4, 16], strides = [1, 1]} : vector<64x16xbf16> to vector<4x16xbf16>
    %c0_18 = arith.constant 0 : index
    %c1 = arith.constant 1 : index
    %c32 = arith.constant 32 : index
    %136 = vector.load %arg10[%c0_18, %c1, %c32] : memref<5x5x64xbf16, #tpu.memory_space<vmem>>, vector<1x4x16xbf16>
    %137 = vector.shape_cast %136 : vector<1x4x16xbf16> to vector<4x16xbf16>
    %138 = vector.shape_cast %135 : vector<4x16xbf16> to vector<1x4x16xbf16>
    tpu.vector_store %arg10[%c0_18, %c1, %c32], %138 {strides = array<i32>} : memref<5x5x64xbf16, #tpu.memory_space<vmem>>, vector<1x4x16xbf16>,
    %139 = vector.extract_strided_slice %130 {offsets = [32, 0], sizes = [4, 16], strides = [1, 1]} : vector<64x16xbf16> to vector<4x16xbf16>
    %c1_19 = arith.constant 1 : index
    %c0_20 = arith.constant 0 : index
    %c16 = arith.constant 16 : index
    %140 = vector.load %arg10[%c1_19, %c0_20, %c16] : memref<5x5x64xbf16, #tpu.memory_space<vmem>>, vector<1x4x16xbf16>
    %141 = vector.shape_cast %140 : vector<1x4x16xbf16> to vector<4x16xbf16>
    %142 = vector.shape_cast %139 : vector<4x16xbf16> to vector<1x4x16xbf16>
    tpu.vector_store %arg10[%c1_19, %c0_20, %c16], %142 {strides = array<i32>} : memref<5x5x64xbf16, #tpu.memory_space<vmem>>, vector<1x4x16xbf16>,
    %143 = vector.extract_strided_slice %130 {offsets = [48, 0], sizes = [4, 16], strides = [1, 1]} : vector<64x16xbf16> to vector<4x16xbf16>
    %c1_21 = arith.constant 1 : index
    %c1_22 = arith.constant 1 : index
    %c0_23 = arith.constant 0 : index
    %144 = vector.load %arg10[%c1_21, %c1_22, %c0_23] : memref<5x5x64xbf16, #tpu.memory_space<vmem>>, vector<1x4x16xbf16>
    %145 = vector.shape_cast %144 : vector<1x4x16xbf16> to vector<4x16xbf16>
    %146 = vector.shape_cast %143 : vector<4x16xbf16> to vector<1x4x16xbf16>
    tpu.vector_store %arg10[%c1_21, %c1_22, %c0_23], %146 {strides = array<i32>} : memref<5x5x64xbf16, #tpu.memory_space<vmem>>, vector<1x4x16xbf16>,
    %147 = vector.extract_strided_slice %130 {offsets = [4, 0], sizes = [4, 16], strides = [1, 1]} : vector<64x16xbf16> to vector<4x16xbf16>
    %c1_24 = arith.constant 1 : index
    %c0_25 = arith.constant 0 : index
    %c48_26 = arith.constant 48 : index
    %148 = vector.load %arg10[%c1_24, %c0_25, %c48_26] : memref<5x5x64xbf16, #tpu.memory_space<vmem>>, vector<1x4x16xbf16>
    %149 = vector.shape_cast %148 : vector<1x4x16xbf16> to vector<4x16xbf16>
    %150 = vector.shape_cast %147 : vector<4x16xbf16> to vector<1x4x16xbf16>
    tpu.vector_store %arg10[%c1_24, %c0_25, %c48_26], %150 {strides = array<i32>} : memref<5x5x64xbf16, #tpu.memory_space<vmem>>, vector<1x4x16xbf16>,
    %151 = vector.extract_strided_slice %130 {offsets = [20, 0], sizes = [4, 16], strides = [1, 1]} : vector<64x16xbf16> to vector<4x16xbf16>
    %c1_27 = arith.constant 1 : index
    %c1_28 = arith.constant 1 : index
    %c32_29 = arith.constant 32 : index
    %152 = vector.load %arg10[%c1_27, %c1_28, %c32_29] : memref<5x5x64xbf16, #tpu.memory_space<vmem>>, vector<1x4x16xbf16>
    %153 = vector.shape_cast %152 : vector<1x4x16xbf16> to vector<4x16xbf16>
    %154 = vector.shape_cast %151 : vector<4x16xbf16> to vector<1x4x16xbf16>
    tpu.vector_store %arg10[%c1_27, %c1_28, %c32_29], %154 {strides = array<i32>} : memref<5x5x64xbf16, #tpu.memory_space<vmem>>, vector<1x4x16xbf16>,
    %155 = vector.extract_strided_slice %130 {offsets = [36, 0], sizes = [4, 16], strides = [1, 1]} : vector<64x16xbf16> to vector<4x16xbf16>
    %c2 = arith.constant 2 : index
    %c0_30 = arith.constant 0 : index
    %c16_31 = arith.constant 16 : index
    %156 = vector.load %arg10[%c2, %c0_30, %c16_31] : memref<5x5x64xbf16, #tpu.memory_space<vmem>>, vector<1x4x16xbf16>
    %157 = vector.shape_cast %156 : vector<1x4x16xbf16> to vector<4x16xbf16>
    %158 = vector.shape_cast %155 : vector<4x16xbf16> to vector<1x4x16xbf16>
    tpu.vector_store %arg10[%c2, %c0_30, %c16_31], %158 {strides = array<i32>} : memref<5x5x64xbf16, #tpu.memory_space<vmem>>, vector<1x4x16xbf16>,
    %159 = vector.extract_strided_slice %130 {offsets = [52, 0], sizes = [4, 16], strides = [1, 1]} : vector<64x16xbf16> to vector<4x16xbf16>
    %c2_32 = arith.constant 2 : index
    %c1_33 = arith.constant 1 : index
    %c0_34 = arith.constant 0 : index
    %160 = vector.load %arg10[%c2_32, %c1_33, %c0_34] : memref<5x5x64xbf16, #tpu.memory_space<vmem>>, vector<1x4x16xbf16>
    %161 = vector.shape_cast %160 : vector<1x4x16xbf16> to vector<4x16xbf16>
    %162 = vector.shape_cast %159 : vector<4x16xbf16> to vector<1x4x16xbf16>
    tpu.vector_store %arg10[%c2_32, %c1_33, %c0_34], %162 {strides = array<i32>} : memref<5x5x64xbf16, #tpu.memory_space<vmem>>, vector<1x4x16xbf16>,
    %163 = vector.extract_strided_slice %130 {offsets = [8, 0], sizes = [4, 16], strides = [1, 1]} : vector<64x16xbf16> to vector<4x16xbf16>
    %c2_35 = arith.constant 2 : index
    %c0_36 = arith.constant 0 : index
    %c48_37 = arith.constant 48 : index
    %164 = vector.load %arg10[%c2_35, %c0_36, %c48_37] : memref<5x5x64xbf16, #tpu.memory_space<vmem>>, vector<1x4x16xbf16>
    %165 = vector.shape_cast %164 : vector<1x4x16xbf16> to vector<4x16xbf16>
    %166 = vector.shape_cast %163 : vector<4x16xbf16> to vector<1x4x16xbf16>
    tpu.vector_store %arg10[%c2_35, %c0_36, %c48_37], %166 {strides = array<i32>} : memref<5x5x64xbf16, #tpu.memory_space<vmem>>, vector<1x4x16xbf16>,
    %167 = vector.extract_strided_slice %130 {offsets = [24, 0], sizes = [4, 16], strides = [1, 1]} : vector<64x16xbf16> to vector<4x16xbf16>
    %c2_38 = arith.constant 2 : index
    %c1_39 = arith.constant 1 : index
    %c32_40 = arith.constant 32 : index
    %168 = vector.load %arg10[%c2_38, %c1_39, %c32_40] : memref<5x5x64xbf16, #tpu.memory_space<vmem>>, vector<1x4x16xbf16>
    %169 = vector.shape_cast %168 : vector<1x4x16xbf16> to vector<4x16xbf16>
    %170 = vector.shape_cast %167 : vector<4x16xbf16> to vector<1x4x16xbf16>
    tpu.vector_store %arg10[%c2_38, %c1_39, %c32_40], %170 {strides = array<i32>} : memref<5x5x64xbf16, #tpu.memory_space<vmem>>, vector<1x4x16xbf16>,
    %171 = vector.extract_strided_slice %130 {offsets = [40, 0], sizes = [4, 16], strides = [1, 1]} : vector<64x16xbf16> to vector<4x16xbf16>
    %c3 = arith.constant 3 : index
    %c0_41 = arith.constant 0 : index
    %c16_42 = arith.constant 16 : index
    %172 = vector.load %arg10[%c3, %c0_41, %c16_42] : memref<5x5x64xbf16, #tpu.memory_space<vmem>>, vector<1x4x16xbf16>
    %173 = vector.shape_cast %172 : vector<1x4x16xbf16> to vector<4x16xbf16>
    %174 = vector.shape_cast %171 : vector<4x16xbf16> to vector<1x4x16xbf16>
    tpu.vector_store %arg10[%c3, %c0_41, %c16_42], %174 {strides = array<i32>} : memref<5x5x64xbf16, #tpu.memory_space<vmem>>, vector<1x4x16xbf16>,
    %175 = vector.extract_strided_slice %130 {offsets = [56, 0], sizes = [4, 16], strides = [1, 1]} : vector<64x16xbf16> to vector<4x16xbf16>
    %c3_43 = arith.constant 3 : index
    %c1_44 = arith.constant 1 : index
    %c0_45 = arith.constant 0 : index
    %176 = vector.load %arg10[%c3_43, %c1_44, %c0_45] : memref<5x5x64xbf16, #tpu.memory_space<vmem>>, vector<1x4x16xbf16>
    %177 = vector.shape_cast %176 : vector<1x4x16xbf16> to vector<4x16xbf16>
    %178 = vector.shape_cast %175 : vector<4x16xbf16> to vector<1x4x16xbf16>
    tpu.vector_store %arg10[%c3_43, %c1_44, %c0_45], %178 {strides = array<i32>} : memref<5x5x64xbf16, #tpu.memory_space<vmem>>, vector<1x4x16xbf16>,
    %179 = vector.extract_strided_slice %130 {offsets = [12, 0], sizes = [4, 16], strides = [1, 1]} : vector<64x16xbf16> to vector<4x16xbf16>
    %c3_46 = arith.constant 3 : index
    %c0_47 = arith.constant 0 : index
    %c48_48 = arith.constant 48 : index
    %180 = vector.load %arg10[%c3_46, %c0_47, %c48_48] : memref<5x5x64xbf16, #tpu.memory_space<vmem>>, vector<1x4x16xbf16>
    %181 = vector.shape_cast %180 : vector<1x4x16xbf16> to vector<4x16xbf16>
    %182 = vector.shape_cast %179 : vector<4x16xbf16> to vector<1x4x16xbf16>
    tpu.vector_store %arg10[%c3_46, %c0_47, %c48_48], %182 {strides = array<i32>} : memref<5x5x64xbf16, #tpu.memory_space<vmem>>, vector<1x4x16xbf16>,
    %183 = vector.extract_strided_slice %130 {offsets = [28, 0], sizes = [4, 16], strides = [1, 1]} : vector<64x16xbf16> to vector<4x16xbf16>
    %c3_49 = arith.constant 3 : index
    %c1_50 = arith.constant 1 : index
    %c32_51 = arith.constant 32 : index
    %184 = vector.load %arg10[%c3_49, %c1_50, %c32_51] : memref<5x5x64xbf16, #tpu.memory_space<vmem>>, vector<1x4x16xbf16>
    %185 = vector.shape_cast %184 : vector<1x4x16xbf16> to vector<4x16xbf16>
    %186 = vector.shape_cast %183 : vector<4x16xbf16> to vector<1x4x16xbf16>
    tpu.vector_store %arg10[%c3_49, %c1_50, %c32_51], %186 {strides = array<i32>} : memref<5x5x64xbf16, #tpu.memory_space<vmem>>, vector<1x4x16xbf16>,
    %187 = vector.extract_strided_slice %130 {offsets = [44, 0], sizes = [4, 16], strides = [1, 1]} : vector<64x16xbf16> to vector<4x16xbf16>
    %c4 = arith.constant 4 : index
    %c0_52 = arith.constant 0 : index
    %c16_53 = arith.constant 16 : index
    %188 = vector.load %arg10[%c4, %c0_52, %c16_53] : memref<5x5x64xbf16, #tpu.memory_space<vmem>>, vector<1x4x16xbf16>
    %189 = vector.shape_cast %188 : vector<1x4x16xbf16> to vector<4x16xbf16>
    %190 = vector.shape_cast %187 : vector<4x16xbf16> to vector<1x4x16xbf16>
    tpu.vector_store %arg10[%c4, %c0_52, %c16_53], %190 {strides = array<i32>} : memref<5x5x64xbf16, #tpu.memory_space<vmem>>, vector<1x4x16xbf16>,
    %191 = vector.extract_strided_slice %130 {offsets = [60, 0], sizes = [4, 16], strides = [1, 1]} : vector<64x16xbf16> to vector<4x16xbf16>
    %c4_54 = arith.constant 4 : index
    %c1_55 = arith.constant 1 : index
    %c0_56 = arith.constant 0 : index
    %192 = vector.load %arg10[%c4_54, %c1_55, %c0_56] : memref<5x5x64xbf16, #tpu.memory_space<vmem>>, vector<1x4x16xbf16>
    %193 = vector.shape_cast %192 : vector<1x4x16xbf16> to vector<4x16xbf16>
    %194 = vector.shape_cast %191 : vector<4x16xbf16> to vector<1x4x16xbf16>
    tpu.vector_store %arg10[%c4_54, %c1_55, %c0_56], %194 {strides = array<i32>} : memref<5x5x64xbf16, #tpu.memory_space<vmem>>, vector<1x4x16xbf16>,
    %c0_57 = arith.constant 0 : index
    %c0_58 = arith.constant 0 : index
    %c0_59 = arith.constant 0 : index
    %195 = vector.load %arg10[%c0_57, %c0_58, %c0_59] : memref<5x5x64xbf16, #tpu.memory_space<vmem>>, vector<1x4x64xbf16>
    %196 = vector.shape_cast %195 : vector<1x4x64xbf16> to vector<4x64xbf16>
    %c0_60 = arith.constant 0 : index
    %c1_61 = arith.constant 1 : index
    %c0_62 = arith.constant 0 : index
    %197 = vector.load %arg10[%c0_60, %c1_61, %c0_62] : memref<5x5x64xbf16, #tpu.memory_space<vmem>>, vector<1x4x64xbf16>
    %198 = vector.shape_cast %197 : vector<1x4x64xbf16> to vector<4x64xbf16>
    %c1_63 = arith.constant 1 : index
    %c0_64 = arith.constant 0 : index
    %c0_65 = arith.constant 0 : index
    %199 = vector.load %arg10[%c1_63, %c0_64, %c0_65] : memref<5x5x64xbf16, #tpu.memory_space<vmem>>, vector<1x4x64xbf16>
    %200 = vector.shape_cast %199 : vector<1x4x64xbf16> to vector<4x64xbf16>
    %c1_66 = arith.constant 1 : index
    %c1_67 = arith.constant 1 : index
    %c0_68 = arith.constant 0 : index
    %201 = vector.load %arg10[%c1_66, %c1_67, %c0_68] : memref<5x5x64xbf16, #tpu.memory_space<vmem>>, vector<1x4x64xbf16>
    %202 = vector.shape_cast %201 : vector<1x4x64xbf16> to vector<4x64xbf16>
    %203 = tpu.concatenate %196, %198, %200, %202 in 1 : vector<4x64xbf16>, vector<4x64xbf16>, vector<4x64xbf16>, vector<4x64xbf16> -> vector<4x256xbf16>
    %c1_69 = arith.constant 1 : index
    %c0_70 = arith.constant 0 : index
    %c0_71 = arith.constant 0 : index
    %204 = vector.load %arg10[%c1_69, %c0_70, %c0_71] : memref<5x5x64xbf16, #tpu.memory_space<vmem>>, vector<1x4x64xbf16>
    %205 = vector.shape_cast %204 : vector<1x4x64xbf16> to vector<4x64xbf16>
    %c1_72 = arith.constant 1 : index
    %c1_73 = arith.constant 1 : index
    %c0_74 = arith.constant 0 : index
    %206 = vector.load %arg10[%c1_72, %c1_73, %c0_74] : memref<5x5x64xbf16, #tpu.memory_space<vmem>>, vector<1x4x64xbf16>
    %207 = vector.shape_cast %206 : vector<1x4x64xbf16> to vector<4x64xbf16>
    %c2_75 = arith.constant 2 : index
    %c0_76 = arith.constant 0 : index
    %c0_77 = arith.constant 0 : index
    %208 = vector.load %arg10[%c2_75, %c0_76, %c0_77] : memref<5x5x64xbf16, #tpu.memory_space<vmem>>, vector<1x4x64xbf16>
    %209 = vector.shape_cast %208 : vector<1x4x64xbf16> to vector<4x64xbf16>
    %c2_78 = arith.constant 2 : index
    %c1_79 = arith.constant 1 : index
    %c0_80 = arith.constant 0 : index
    %210 = vector.load %arg10[%c2_78, %c1_79, %c0_80] : memref<5x5x64xbf16, #tpu.memory_space<vmem>>, vector<1x4x64xbf16>
    %211 = vector.shape_cast %210 : vector<1x4x64xbf16> to vector<4x64xbf16>
    %212 = tpu.concatenate %205, %207, %209, %211 in 1 : vector<4x64xbf16>, vector<4x64xbf16>, vector<4x64xbf16>, vector<4x64xbf16> -> vector<4x256xbf16>
    %c2_81 = arith.constant 2 : index
    %c0_82 = arith.constant 0 : index
    %c0_83 = arith.constant 0 : index
    %213 = vector.load %arg10[%c2_81, %c0_82, %c0_83] : memref<5x5x64xbf16, #tpu.memory_space<vmem>>, vector<1x4x64xbf16>
    %214 = vector.shape_cast %213 : vector<1x4x64xbf16> to vector<4x64xbf16>
    %c2_84 = arith.constant 2 : index
    %c1_85 = arith.constant 1 : index
    %c0_86 = arith.constant 0 : index
    %215 = vector.load %arg10[%c2_84, %c1_85, %c0_86] : memref<5x5x64xbf16, #tpu.memory_space<vmem>>, vector<1x4x64xbf16>
    %216 = vector.shape_cast %215 : vector<1x4x64xbf16> to vector<4x64xbf16>
    %c3_87 = arith.constant 3 : index
    %c0_88 = arith.constant 0 : index
    %c0_89 = arith.constant 0 : index
    %217 = vector.load %arg10[%c3_87, %c0_88, %c0_89] : memref<5x5x64xbf16, #tpu.memory_space<vmem>>, vector<1x4x64xbf16>
    %218 = vector.shape_cast %217 : vector<1x4x64xbf16> to vector<4x64xbf16>
    %c3_90 = arith.constant 3 : index
    %c1_91 = arith.constant 1 : index
    %c0_92 = arith.constant 0 : index
    %219 = vector.load %arg10[%c3_90, %c1_91, %c0_92] : memref<5x5x64xbf16, #tpu.memory_space<vmem>>, vector<1x4x64xbf16>
    %220 = vector.shape_cast %219 : vector<1x4x64xbf16> to vector<4x64xbf16>
    %221 = tpu.concatenate %214, %216, %218, %220 in 1 : vector<4x64xbf16>, vector<4x64xbf16>, vector<4x64xbf16>, vector<4x64xbf16> -> vector<4x256xbf16>
    %c3_93 = arith.constant 3 : index
    %c0_94 = arith.constant 0 : index
    %c0_95 = arith.constant 0 : index
    %222 = vector.load %arg10[%c3_93, %c0_94, %c0_95] : memref<5x5x64xbf16, #tpu.memory_space<vmem>>, vector<1x4x64xbf16>
    %223 = vector.shape_cast %222 : vector<1x4x64xbf16> to vector<4x64xbf16>
    %c3_96 = arith.constant 3 : index
    %c1_97 = arith.constant 1 : index
    %c0_98 = arith.constant 0 : index
    %224 = vector.load %arg10[%c3_96, %c1_97, %c0_98] : memref<5x5x64xbf16, #tpu.memory_space<vmem>>, vector<1x4x64xbf16>
    %225 = vector.shape_cast %224 : vector<1x4x64xbf16> to vector<4x64xbf16>
    %c4_99 = arith.constant 4 : index
    %c0_100 = arith.constant 0 : index
    %c0_101 = arith.constant 0 : index
    %226 = vector.load %arg10[%c4_99, %c0_100, %c0_101] : memref<5x5x64xbf16, #tpu.memory_space<vmem>>, vector<1x4x64xbf16>
    %227 = vector.shape_cast %226 : vector<1x4x64xbf16> to vector<4x64xbf16>
    %c4_102 = arith.constant 4 : index
    %c1_103 = arith.constant 1 : index
    %c0_104 = arith.constant 0 : index
    %228 = vector.load %arg10[%c4_102, %c1_103, %c0_104] : memref<5x5x64xbf16, #tpu.memory_space<vmem>>, vector<1x4x64xbf16>
    %229 = vector.shape_cast %228 : vector<1x4x64xbf16> to vector<4x64xbf16>
    %230 = tpu.concatenate %223, %225, %227, %229 in 1 : vector<4x64xbf16>, vector<4x64xbf16>, vector<4x64xbf16>, vector<4x64xbf16> -> vector<4x256xbf16>
    %231 = tpu.concatenate %203, %212, %221, %230 in 0 : vector<4x256xbf16>, vector<4x256xbf16>, vector<4x256xbf16>, vector<4x256xbf16> -> vector<16x256xbf16>
    %c0_105 = arith.constant 0 : index
    %c0_106 = arith.constant 0 : index
    %232 = vector.load %arg4[%c0_105, %c0_106] : memref<256x32xbf16, #tpu.memory_space<vmem>>, vector<256x32xbf16>
    %cst_107 = arith.constant dense<0.000000e+00> : vector<16x32xf32>
    %233 = tpu.matmul %231, %232, %cst_107 {dimension_numbers = #tpu.dot_dimension_numbers<[1], [0], [0], [1], [0, 0, 1, 1], [], []>} : vector<16x256xbf16>, vector<256x32xbf16>, vector<16x32xf32> -> vector<16x32xf32>
    %c0_108 = arith.constant 0 : index
    %c0_109 = arith.constant 0 : index
    %234 = vector.load %arg5[%c0_108, %c0_109] : memref<1x32xf32, #tpu.memory_space<vmem>>, vector<1x32xf32>
    %235 = vector.broadcast %234 : vector<1x32xf32> to vector<16x32xf32>
    %236 = arith.addf %233, %235 : vector<16x32xf32>
    %cst_110 = arith.constant 0.000000e+00 : f32
    %237 = vector.broadcast %cst_110 : f32 to vector<16x32xf32>
    %238 = arith.maximumf %236, %237 : vector<16x32xf32>
    %239 = arith.truncf %238 : vector<16x32xf32> to vector<16x32xbf16>
    %c0_111 = arith.constant 0 : index
    %c0_112 = arith.constant 0 : index
    %c0_113 = arith.constant 0 : index
    %240 = vector.load %arg8[%c0_111, %c0_112, %c0_113] : memref<1x16x32xbf16, #tpu.memory_space<vmem>>, vector<1x16x32xbf16>
    %241 = vector.shape_cast %240 : vector<1x16x32xbf16> to vector<16x32xbf16>
    %242 = vector.shape_cast %239 : vector<16x32xbf16> to vector<1x16x32xbf16>
    tpu.vector_store %arg8[%c0_111, %c0_112, %c0_113], %242 {strides = array<i32>} : memref<1x16x32xbf16, #tpu.memory_space<vmem>>, vector<1x16x32xbf16>,
    %243 = vector.extract_strided_slice %239 {offsets = [0, 0], sizes = [4, 32], strides = [1, 1]} : vector<16x32xbf16> to vector<4x32xbf16>
    %c1_114 = arith.constant 1 : index
    %c1_115 = arith.constant 1 : index
    %c0_116 = arith.constant 0 : index
    %244 = vector.load %arg11[%c1_114, %c1_115, %c0_116] : memref<6x6x32xbf16, #tpu.memory_space<vmem>>, vector<1x4x32xbf16>
    %245 = vector.shape_cast %244 : vector<1x4x32xbf16> to vector<4x32xbf16>
    %246 = vector.shape_cast %243 : vector<4x32xbf16> to vector<1x4x32xbf16>
    tpu.vector_store %arg11[%c1_114, %c1_115, %c0_116], %246 {strides = array<i32>} : memref<6x6x32xbf16, #tpu.memory_space<vmem>>, vector<1x4x32xbf16>,
    %247 = vector.extract_strided_slice %239 {offsets = [4, 0], sizes = [4, 32], strides = [1, 1]} : vector<16x32xbf16> to vector<4x32xbf16>
    %c2_117 = arith.constant 2 : index
    %c1_118 = arith.constant 1 : index
    %c0_119 = arith.constant 0 : index
    %248 = vector.load %arg11[%c2_117, %c1_118, %c0_119] : memref<6x6x32xbf16, #tpu.memory_space<vmem>>, vector<1x4x32xbf16>
    %249 = vector.shape_cast %248 : vector<1x4x32xbf16> to vector<4x32xbf16>
    %250 = vector.shape_cast %247 : vector<4x32xbf16> to vector<1x4x32xbf16>
    tpu.vector_store %arg11[%c2_117, %c1_118, %c0_119], %250 {strides = array<i32>} : memref<6x6x32xbf16, #tpu.memory_space<vmem>>, vector<1x4x32xbf16>,
    %251 = vector.extract_strided_slice %239 {offsets = [8, 0], sizes = [4, 32], strides = [1, 1]} : vector<16x32xbf16> to vector<4x32xbf16>
    %c3_120 = arith.constant 3 : index
    %c1_121 = arith.constant 1 : index
    %c0_122 = arith.constant 0 : index
    %252 = vector.load %arg11[%c3_120, %c1_121, %c0_122] : memref<6x6x32xbf16, #tpu.memory_space<vmem>>, vector<1x4x32xbf16>
    %253 = vector.shape_cast %252 : vector<1x4x32xbf16> to vector<4x32xbf16>
    %254 = vector.shape_cast %251 : vector<4x32xbf16> to vector<1x4x32xbf16>
    tpu.vector_store %arg11[%c3_120, %c1_121, %c0_122], %254 {strides = array<i32>} : memref<6x6x32xbf16, #tpu.memory_space<vmem>>, vector<1x4x32xbf16>,
    %255 = vector.extract_strided_slice %239 {offsets = [12, 0], sizes = [4, 32], strides = [1, 1]} : vector<16x32xbf16> to vector<4x32xbf16>
    %c4_123 = arith.constant 4 : index
    %c1_124 = arith.constant 1 : index
    %c0_125 = arith.constant 0 : index
    %256 = vector.load %arg11[%c4_123, %c1_124, %c0_125] : memref<6x6x32xbf16, #tpu.memory_space<vmem>>, vector<1x4x32xbf16>
    %257 = vector.shape_cast %256 : vector<1x4x32xbf16> to vector<4x32xbf16>
    %258 = vector.shape_cast %255 : vector<4x32xbf16> to vector<1x4x32xbf16>
    tpu.vector_store %arg11[%c4_123, %c1_124, %c0_125], %258 {strides = array<i32>} : memref<6x6x32xbf16, #tpu.memory_space<vmem>>, vector<1x4x32xbf16>,
    %c0_126 = arith.constant 0 : index
    %c0_127 = arith.constant 0 : index
    %c0_128 = arith.constant 0 : index
    %259 = vector.load %arg11[%c0_126, %c0_127, %c0_128] : memref<6x6x32xbf16, #tpu.memory_space<vmem>>, vector<1x4x32xbf16>
    %260 = vector.shape_cast %259 : vector<1x4x32xbf16> to vector<4x32xbf16>
    %c0_129 = arith.constant 0 : index
    %c1_130 = arith.constant 1 : index
    %c0_131 = arith.constant 0 : index
    %261 = vector.load %arg11[%c0_129, %c1_130, %c0_131] : memref<6x6x32xbf16, #tpu.memory_space<vmem>>, vector<1x4x32xbf16>
    %262 = vector.shape_cast %261 : vector<1x4x32xbf16> to vector<4x32xbf16>
    %c0_132 = arith.constant 0 : index
    %c2_133 = arith.constant 2 : index
    %c0_134 = arith.constant 0 : index
    %263 = vector.load %arg11[%c0_132, %c2_133, %c0_134] : memref<6x6x32xbf16, #tpu.memory_space<vmem>>, vector<1x4x32xbf16>
    %264 = vector.shape_cast %263 : vector<1x4x32xbf16> to vector<4x32xbf16>
    %c1_135 = arith.constant 1 : index
    %c0_136 = arith.constant 0 : index
    %c0_137 = arith.constant 0 : index
    %265 = vector.load %arg11[%c1_135, %c0_136, %c0_137] : memref<6x6x32xbf16, #tpu.memory_space<vmem>>, vector<1x4x32xbf16>
    %266 = vector.shape_cast %265 : vector<1x4x32xbf16> to vector<4x32xbf16>
    %c1_138 = arith.constant 1 : index
    %c1_139 = arith.constant 1 : index
    %c0_140 = arith.constant 0 : index
    %267 = vector.load %arg11[%c1_138, %c1_139, %c0_140] : memref<6x6x32xbf16, #tpu.memory_space<vmem>>, vector<1x4x32xbf16>
    %268 = vector.shape_cast %267 : vector<1x4x32xbf16> to vector<4x32xbf16>
    %c1_141 = arith.constant 1 : index
    %c2_142 = arith.constant 2 : index
    %c0_143 = arith.constant 0 : index
    %269 = vector.load %arg11[%c1_141, %c2_142, %c0_143] : memref<6x6x32xbf16, #tpu.memory_space<vmem>>, vector<1x4x32xbf16>
    %270 = vector.shape_cast %269 : vector<1x4x32xbf16> to vector<4x32xbf16>
    %c2_144 = arith.constant 2 : index
    %c0_145 = arith.constant 0 : index
    %c0_146 = arith.constant 0 : index
    %271 = vector.load %arg11[%c2_144, %c0_145, %c0_146] : memref<6x6x32xbf16, #tpu.memory_space<vmem>>, vector<1x4x32xbf16>
    %272 = vector.shape_cast %271 : vector<1x4x32xbf16> to vector<4x32xbf16>
    %c2_147 = arith.constant 2 : index
    %c1_148 = arith.constant 1 : index
    %c0_149 = arith.constant 0 : index
    %273 = vector.load %arg11[%c2_147, %c1_148, %c0_149] : memref<6x6x32xbf16, #tpu.memory_space<vmem>>, vector<1x4x32xbf16>
    %274 = vector.shape_cast %273 : vector<1x4x32xbf16> to vector<4x32xbf16>
    %c2_150 = arith.constant 2 : index
    %c2_151 = arith.constant 2 : index
    %c0_152 = arith.constant 0 : index
    %275 = vector.load %arg11[%c2_150, %c2_151, %c0_152] : memref<6x6x32xbf16, #tpu.memory_space<vmem>>, vector<1x4x32xbf16>
    %276 = vector.shape_cast %275 : vector<1x4x32xbf16> to vector<4x32xbf16>
    %277 = tpu.concatenate %260, %262, %264, %266, %268, %270, %272, %274, %276 in 1 : vector<4x32xbf16>, vector<4x32xbf16>, vector<4x32xbf16>, vector<4x32xbf16>, vector<4x32xbf16>, vector<4x32xbf16>, vector<4x32xbf16>, vector<4x32xbf16>, vector<4x32xbf16> -> vector<4x288xbf16>
    %c1_153 = arith.constant 1 : index
    %c0_154 = arith.constant 0 : index
    %c0_155 = arith.constant 0 : index
    %278 = vector.load %arg11[%c1_153, %c0_154, %c0_155] : memref<6x6x32xbf16, #tpu.memory_space<vmem>>, vector<1x4x32xbf16>
    %279 = vector.shape_cast %278 : vector<1x4x32xbf16> to vector<4x32xbf16>
    %c1_156 = arith.constant 1 : index
    %c1_157 = arith.constant 1 : index
    %c0_158 = arith.constant 0 : index
    %280 = vector.load %arg11[%c1_156, %c1_157, %c0_158] : memref<6x6x32xbf16, #tpu.memory_space<vmem>>, vector<1x4x32xbf16>
    %281 = vector.shape_cast %280 : vector<1x4x32xbf16> to vector<4x32xbf16>
    %c1_159 = arith.constant 1 : index
    %c2_160 = arith.constant 2 : index
    %c0_161 = arith.constant 0 : index
    %282 = vector.load %arg11[%c1_159, %c2_160, %c0_161] : memref<6x6x32xbf16, #tpu.memory_space<vmem>>, vector<1x4x32xbf16>
    %283 = vector.shape_cast %282 : vector<1x4x32xbf16> to vector<4x32xbf16>
    %c2_162 = arith.constant 2 : index
    %c0_163 = arith.constant 0 : index
    %c0_164 = arith.constant 0 : index
    %284 = vector.load %arg11[%c2_162, %c0_163, %c0_164] : memref<6x6x32xbf16, #tpu.memory_space<vmem>>, vector<1x4x32xbf16>
    %285 = vector.shape_cast %284 : vector<1x4x32xbf16> to vector<4x32xbf16>
    %c2_165 = arith.constant 2 : index
    %c1_166 = arith.constant 1 : index
    %c0_167 = arith.constant 0 : index
    %286 = vector.load %arg11[%c2_165, %c1_166, %c0_167] : memref<6x6x32xbf16, #tpu.memory_space<vmem>>, vector<1x4x32xbf16>
    %287 = vector.shape_cast %286 : vector<1x4x32xbf16> to vector<4x32xbf16>
    %c2_168 = arith.constant 2 : index
    %c2_169 = arith.constant 2 : index
    %c0_170 = arith.constant 0 : index
    %288 = vector.load %arg11[%c2_168, %c2_169, %c0_170] : memref<6x6x32xbf16, #tpu.memory_space<vmem>>, vector<1x4x32xbf16>
    %289 = vector.shape_cast %288 : vector<1x4x32xbf16> to vector<4x32xbf16>
    %c3_171 = arith.constant 3 : index
    %c0_172 = arith.constant 0 : index
    %c0_173 = arith.constant 0 : index
    %290 = vector.load %arg11[%c3_171, %c0_172, %c0_173] : memref<6x6x32xbf16, #tpu.memory_space<vmem>>, vector<1x4x32xbf16>
    %291 = vector.shape_cast %290 : vector<1x4x32xbf16> to vector<4x32xbf16>
    %c3_174 = arith.constant 3 : index
    %c1_175 = arith.constant 1 : index
    %c0_176 = arith.constant 0 : index
    %292 = vector.load %arg11[%c3_174, %c1_175, %c0_176] : memref<6x6x32xbf16, #tpu.memory_space<vmem>>, vector<1x4x32xbf16>
    %293 = vector.shape_cast %292 : vector<1x4x32xbf16> to vector<4x32xbf16>
    %c3_177 = arith.constant 3 : index
    %c2_178 = arith.constant 2 : index
    %c0_179 = arith.constant 0 : index
    %294 = vector.load %arg11[%c3_177, %c2_178, %c0_179] : memref<6x6x32xbf16, #tpu.memory_space<vmem>>, vector<1x4x32xbf16>
    %295 = vector.shape_cast %294 : vector<1x4x32xbf16> to vector<4x32xbf16>
    %296 = tpu.concatenate %279, %281, %283, %285, %287, %289, %291, %293, %295 in 1 : vector<4x32xbf16>, vector<4x32xbf16>, vector<4x32xbf16>, vector<4x32xbf16>, vector<4x32xbf16>, vector<4x32xbf16>, vector<4x32xbf16>, vector<4x32xbf16>, vector<4x32xbf16> -> vector<4x288xbf16>
    %c2_180 = arith.constant 2 : index
    %c0_181 = arith.constant 0 : index
    %c0_182 = arith.constant 0 : index
    %297 = vector.load %arg11[%c2_180, %c0_181, %c0_182] : memref<6x6x32xbf16, #tpu.memory_space<vmem>>, vector<1x4x32xbf16>
    %298 = vector.shape_cast %297 : vector<1x4x32xbf16> to vector<4x32xbf16>
    %c2_183 = arith.constant 2 : index
    %c1_184 = arith.constant 1 : index
    %c0_185 = arith.constant 0 : index
    %299 = vector.load %arg11[%c2_183, %c1_184, %c0_185] : memref<6x6x32xbf16, #tpu.memory_space<vmem>>, vector<1x4x32xbf16>
    %300 = vector.shape_cast %299 : vector<1x4x32xbf16> to vector<4x32xbf16>
    %c2_186 = arith.constant 2 : index
    %c2_187 = arith.constant 2 : index
    %c0_188 = arith.constant 0 : index
    %301 = vector.load %arg11[%c2_186, %c2_187, %c0_188] : memref<6x6x32xbf16, #tpu.memory_space<vmem>>, vector<1x4x32xbf16>
    %302 = vector.shape_cast %301 : vector<1x4x32xbf16> to vector<4x32xbf16>
    %c3_189 = arith.constant 3 : index
    %c0_190 = arith.constant 0 : index
    %c0_191 = arith.constant 0 : index
    %303 = vector.load %arg11[%c3_189, %c0_190, %c0_191] : memref<6x6x32xbf16, #tpu.memory_space<vmem>>, vector<1x4x32xbf16>
    %304 = vector.shape_cast %303 : vector<1x4x32xbf16> to vector<4x32xbf16>
    %c3_192 = arith.constant 3 : index
    %c1_193 = arith.constant 1 : index
    %c0_194 = arith.constant 0 : index
    %305 = vector.load %arg11[%c3_192, %c1_193, %c0_194] : memref<6x6x32xbf16, #tpu.memory_space<vmem>>, vector<1x4x32xbf16>
    %306 = vector.shape_cast %305 : vector<1x4x32xbf16> to vector<4x32xbf16>
    %c3_195 = arith.constant 3 : index
    %c2_196 = arith.constant 2 : index
    %c0_197 = arith.constant 0 : index
    %307 = vector.load %arg11[%c3_195, %c2_196, %c0_197] : memref<6x6x32xbf16, #tpu.memory_space<vmem>>, vector<1x4x32xbf16>
    %308 = vector.shape_cast %307 : vector<1x4x32xbf16> to vector<4x32xbf16>
    %c4_198 = arith.constant 4 : index
    %c0_199 = arith.constant 0 : index
    %c0_200 = arith.constant 0 : index
    %309 = vector.load %arg11[%c4_198, %c0_199, %c0_200] : memref<6x6x32xbf16, #tpu.memory_space<vmem>>, vector<1x4x32xbf16>
    %310 = vector.shape_cast %309 : vector<1x4x32xbf16> to vector<4x32xbf16>
    %c4_201 = arith.constant 4 : index
    %c1_202 = arith.constant 1 : index
    %c0_203 = arith.constant 0 : index
    %311 = vector.load %arg11[%c4_201, %c1_202, %c0_203] : memref<6x6x32xbf16, #tpu.memory_space<vmem>>, vector<1x4x32xbf16>
    %312 = vector.shape_cast %311 : vector<1x4x32xbf16> to vector<4x32xbf16>
    %c4_204 = arith.constant 4 : index
    %c2_205 = arith.constant 2 : index
    %c0_206 = arith.constant 0 : index
    %313 = vector.load %arg11[%c4_204, %c2_205, %c0_206] : memref<6x6x32xbf16, #tpu.memory_space<vmem>>, vector<1x4x32xbf16>
    %314 = vector.shape_cast %313 : vector<1x4x32xbf16> to vector<4x32xbf16>
    %315 = tpu.concatenate %298, %300, %302, %304, %306, %308, %310, %312, %314 in 1 : vector<4x32xbf16>, vector<4x32xbf16>, vector<4x32xbf16>, vector<4x32xbf16>, vector<4x32xbf16>, vector<4x32xbf16>, vector<4x32xbf16>, vector<4x32xbf16>, vector<4x32xbf16> -> vector<4x288xbf16>
    %c3_207 = arith.constant 3 : index
    %c0_208 = arith.constant 0 : index
    %c0_209 = arith.constant 0 : index
    %316 = vector.load %arg11[%c3_207, %c0_208, %c0_209] : memref<6x6x32xbf16, #tpu.memory_space<vmem>>, vector<1x4x32xbf16>
    %317 = vector.shape_cast %316 : vector<1x4x32xbf16> to vector<4x32xbf16>
    %c3_210 = arith.constant 3 : index
    %c1_211 = arith.constant 1 : index
    %c0_212 = arith.constant 0 : index
    %318 = vector.load %arg11[%c3_210, %c1_211, %c0_212] : memref<6x6x32xbf16, #tpu.memory_space<vmem>>, vector<1x4x32xbf16>
    %319 = vector.shape_cast %318 : vector<1x4x32xbf16> to vector<4x32xbf16>
    %c3_213 = arith.constant 3 : index
    %c2_214 = arith.constant 2 : index
    %c0_215 = arith.constant 0 : index
    %320 = vector.load %arg11[%c3_213, %c2_214, %c0_215] : memref<6x6x32xbf16, #tpu.memory_space<vmem>>, vector<1x4x32xbf16>
    %321 = vector.shape_cast %320 : vector<1x4x32xbf16> to vector<4x32xbf16>
    %c4_216 = arith.constant 4 : index
    %c0_217 = arith.constant 0 : index
    %c0_218 = arith.constant 0 : index
    %322 = vector.load %arg11[%c4_216, %c0_217, %c0_218] : memref<6x6x32xbf16, #tpu.memory_space<vmem>>, vector<1x4x32xbf16>
    %323 = vector.shape_cast %322 : vector<1x4x32xbf16> to vector<4x32xbf16>
    %c4_219 = arith.constant 4 : index
    %c1_220 = arith.constant 1 : index
    %c0_221 = arith.constant 0 : index
    %324 = vector.load %arg11[%c4_219, %c1_220, %c0_221] : memref<6x6x32xbf16, #tpu.memory_space<vmem>>, vector<1x4x32xbf16>
    %325 = vector.shape_cast %324 : vector<1x4x32xbf16> to vector<4x32xbf16>
    %c4_222 = arith.constant 4 : index
    %c2_223 = arith.constant 2 : index
    %c0_224 = arith.constant 0 : index
    %326 = vector.load %arg11[%c4_222, %c2_223, %c0_224] : memref<6x6x32xbf16, #tpu.memory_space<vmem>>, vector<1x4x32xbf16>
    %327 = vector.shape_cast %326 : vector<1x4x32xbf16> to vector<4x32xbf16>
    %c5 = arith.constant 5 : index
    %c0_225 = arith.constant 0 : index
    %c0_226 = arith.constant 0 : index
    %328 = vector.load %arg11[%c5, %c0_225, %c0_226] : memref<6x6x32xbf16, #tpu.memory_space<vmem>>, vector<1x4x32xbf16>
    %329 = vector.shape_cast %328 : vector<1x4x32xbf16> to vector<4x32xbf16>
    %c5_227 = arith.constant 5 : index
    %c1_228 = arith.constant 1 : index
    %c0_229 = arith.constant 0 : index
    %330 = vector.load %arg11[%c5_227, %c1_228, %c0_229] : memref<6x6x32xbf16, #tpu.memory_space<vmem>>, vector<1x4x32xbf16>
    %331 = vector.shape_cast %330 : vector<1x4x32xbf16> to vector<4x32xbf16>
    %c5_230 = arith.constant 5 : index
    %c2_231 = arith.constant 2 : index
    %c0_232 = arith.constant 0 : index
    %332 = vector.load %arg11[%c5_230, %c2_231, %c0_232] : memref<6x6x32xbf16, #tpu.memory_space<vmem>>, vector<1x4x32xbf16>
    %333 = vector.shape_cast %332 : vector<1x4x32xbf16> to vector<4x32xbf16>
    %334 = tpu.concatenate %317, %319, %321, %323, %325, %327, %329, %331, %333 in 1 : vector<4x32xbf16>, vector<4x32xbf16>, vector<4x32xbf16>, vector<4x32xbf16>, vector<4x32xbf16>, vector<4x32xbf16>, vector<4x32xbf16>, vector<4x32xbf16>, vector<4x32xbf16> -> vector<4x288xbf16>
    %335 = tpu.concatenate %277, %296, %315, %334 in 0 : vector<4x288xbf16>, vector<4x288xbf16>, vector<4x288xbf16>, vector<4x288xbf16> -> vector<16x288xbf16>
    %c0_233 = arith.constant 0 : index
    %c0_234 = arith.constant 0 : index
    %336 = vector.load %arg6[%c0_233, %c0_234] : memref<288x128xbf16, #tpu.memory_space<vmem>>, vector<288x128xbf16>
    %cst_235 = arith.constant dense<0.000000e+00> : vector<16x128xf32>
    %337 = tpu.matmul %335, %336, %cst_235 {dimension_numbers = #tpu.dot_dimension_numbers<[1], [0], [0], [1], [0, 0, 1, 1], [], []>} : vector<16x288xbf16>, vector<288x128xbf16>, vector<16x128xf32> -> vector<16x128xf32>
    %c0_236 = arith.constant 0 : index
    %c0_237 = arith.constant 0 : index
    %338 = vector.load %arg7[%c0_236, %c0_237] : memref<1x128xf32, #tpu.memory_space<vmem>>, vector<1x128xf32>
    %339 = vector.broadcast %338 : vector<1x128xf32> to vector<16x128xf32>
    %340 = arith.addf %337, %339 : vector<16x128xf32>
    %341 = arith.truncf %340 : vector<16x128xf32> to vector<16x128xbf16>
    %c0_238 = arith.constant 0 : index
    %c0_239 = arith.constant 0 : index
    %c0_240 = arith.constant 0 : index
    %342 = vector.load %arg9[%c0_238, %c0_239, %c0_240] : memref<1x16x128xbf16, #tpu.memory_space<vmem>>, vector<1x16x128xbf16>
    %343 = vector.shape_cast %342 : vector<1x16x128xbf16> to vector<16x128xbf16>
    %344 = vector.shape_cast %341 : vector<16x128xbf16> to vector<1x16x128xbf16>
    tpu.vector_store %arg9[%c0_238, %c0_239, %c0_240], %344 {strides = array<i32>} : memref<1x16x128xbf16, #tpu.memory_space<vmem>>, vector<1x16x128xbf16>,
    return
  }
  func.func @transform_0(%arg0: i32) -> (i32, i32, i32, i32) {
    %c0_i32 = arith.constant 0 : i32
    %c0_i32_0 = arith.constant 0 : i32
    %c0_i32_1 = arith.constant 0 : i32
    %c0_i32_2 = arith.constant 0 : i32
    return %arg0, %c0_i32, %c0_i32_0, %c0_i32_1 : i32, i32, i32, i32
  }
  func.func @transform_1(%arg0: i32) -> (i32, i32) {
    %c0_i32 = arith.constant 0 : i32
    %c0_i32_0 = arith.constant 0 : i32
    %c0_i32_1 = arith.constant 0 : i32
    return %c0_i32, %c0_i32_0 : i32, i32
  }
  func.func @transform_2(%arg0: i32) -> (i32, i32) {
    %c0_i32 = arith.constant 0 : i32
    %c0_i32_0 = arith.constant 0 : i32
    %c0_i32_1 = arith.constant 0 : i32
    return %c0_i32, %c0_i32_0 : i32, i32
  }
  func.func @transform_3(%arg0: i32) -> (i32, i32) {
    %c0_i32 = arith.constant 0 : i32
    %c0_i32_0 = arith.constant 0 : i32
    %c0_i32_1 = arith.constant 0 : i32
    return %c0_i32, %c0_i32_0 : i32, i32
  }
  func.func @transform_4(%arg0: i32) -> (i32, i32) {
    %c0_i32 = arith.constant 0 : i32
    %c0_i32_0 = arith.constant 0 : i32
    %c0_i32_1 = arith.constant 0 : i32
    return %c0_i32, %c0_i32_0 : i32, i32
  }
  func.func @transform_5(%arg0: i32) -> (i32, i32) {
    %c0_i32 = arith.constant 0 : i32
    %c0_i32_0 = arith.constant 0 : i32
    %c0_i32_1 = arith.constant 0 : i32
    return %c0_i32, %c0_i32_0 : i32, i32
  }
  func.func @transform_6(%arg0: i32) -> (i32, i32) {
    %c0_i32 = arith.constant 0 : i32
    %c0_i32_0 = arith.constant 0 : i32
    %c0_i32_1 = arith.constant 0 : i32
    return %c0_i32, %c0_i32_0 : i32, i32
  }
  func.func @transform_7(%arg0: i32) -> (i32, i32, i32) {
    %c0_i32 = arith.constant 0 : i32
    %c0_i32_0 = arith.constant 0 : i32
    %c0_i32_1 = arith.constant 0 : i32
    return %arg0, %c0_i32, %c0_i32_0 : i32, i32, i32
  }
  func.func @transform_8(%arg0: i32) -> (i32, i32, i32) {
    %c0_i32 = arith.constant 0 : i32
    %c0_i32_0 = arith.constant 0 : i32
    %c0_i32_1 = arith.constant 0 : i32
    return %arg0, %c0_i32, %c0_i32_0 : i32, i32, i32
  }
}

</mosaic_0001>

<bundles_post_ra>
// kernel: one_stage_detector_forward.1
= control target key start
LH: loop header
LB: loop body
LE: loop exit
PB: predicated region body
PF: predicated region fallthrough
CT: control target
= control target key end

     0   :  { %14 = vsyncpa [#allocation5], 0  ;;  %s2738_s0 = inlined_call_operand.vmem [shape: bf16[2,5,5,48], index: 0, kind: input, shape index: {}]   ;;  %s2739_s1 = inlined_call_operand.vmem [shape: bf16[48,16], index: 1, kind: input, shape index: {}]   ;;  %s2740_s2 = inlined_call_operand.vmem [shape: f32[1,16], index: 2, kind: input, shape index: {}]   ;;  %s2741_s3 = inlined_call_operand.vmem [shape: bf16[256,32], index: 3, kind: input, shape index: {}]   ;;  %s2742_s4 = inlined_call_operand.vmem [shape: f32[1,32], index: 4, kind: input, shape index: {}]   ;;  %s2743_s5 = inlined_call_operand.vmem [shape: bf16[288,128], index: 5, kind: input, shape index: {}]   ;;  %s2744_s6 = inlined_call_operand.vmem [shape: f32[1,128], index: 6, kind: input, shape index: {}]   ;;  %s2745_s7 = inlined_call_operand.hbm [shape: bf16[2,16,32], index: 7, kind: output, shape index: {0}]   ;;  %s2746_s8 = inlined_call_operand.vmem [shape: bf16[2,16,128], index: 8, kind: output, shape index: {1}]  }
   0x1   :  { %16 = vsyncpa [#allocation5 + $0x1], 0  ;;  %s2246_s27 = smov 0   ;;  %s2248_s28 = smov 0  }
   0x2   :  { %s2250_s29 = smov 0   ;;  %s2252_s30 = smov 0  }
   0x3 LB: > { %s2267_s9 = sadd.s32 4294967295, %s2183_s30   ;;  %s1805_s10 = sadd.s32 4294967294, %s2183_s30   ;;  %s2183_s30 = sphi %s2252_s30, %s2760_s30   ;;  %s2179_s29 = sphi %s2250_s29, %s2759_s29   ;;  %s2175_s28 = sphi %s2248_s28, %s2758_s28   ;;  %s2171_s27 = sphi %s2246_s27, %s2757_s27  }
   0x4   : > { %s2271_s11 = sadd.s32 1, %s2183_s30   ;;  %s181_s12 = sadd.s32 1, %s2179_s29 }
   0x5   : > { %s178_s13 = ssub.s32 %s2183_s30, %s2271_s11  ;;  %p191_p0 = scmp.ne.s32.totalorder %s2179_s29, %s2175_s28 }
   0x6   : > { %p179_p1 = scmp.eq.s32.totalorder %s178_s13, 0  ;;  %p192_p2 = scmp.eq.s32.totalorder %s2267_s9, 1 }
   0x7   : > { %p197_p3 = scmp.ne.s32.totalorder %s2175_s28, %s2171_s27  ;;  %p198_p4 = scmp.eq.s32.totalorder %s1805_s10, 1 }
   0x8   : > { %s2282_s14 = scalar_select %p179_p1, %s2179_s29, %s181_s12  }
   0x9   : > { %p2284_p5 = por %p192_p2, %p191_p0  ;;  %p2288_p6 = por %p198_p4, %p197_p3 }
   0xa   : > { %p1808_p7 = scmp.ge.s32.totalorder %s2183_s30, 1  ;;  %p268_p8 = scmp.lt.s32.totalorder %s2183_s30, 3 }
   0xc   : > { %p269_p9 = pnand %p1808_p7, %p268_p8 }
   0xd   : > { %p307_p10 = scmp.lt.s32.totalorder (!%p269_p9), %s2267_s9, 1  ;;  %v2062_v1 = vld [vmem:[%s2739_s1] sm:$0xff] (!%p269_p9)   ;;  %s2185_s24 = smov (!%p269_p9), 116   ;;  %v2063_v10 = vld [vmem:[%s2739_s1 + $0x8] sm:$0xff] (!%p269_p9)   ;;  %vm549_vm0 = vcmask (!%p269_p9), 1041408   ;;  %v2064_v18 = vld [vmem:[%s2739_s1 + $0x10] sm:$0xff] (!%p269_p9)  }
   0xe   : > { %272 = sbr.rel (%p269_p9) target bundleno = 1321 (0x529), region = 48  ;;  %1980 = vmatprep.subr.bf16.mxu0 (!%p269_p9), %v2062_v1  ;;  %s2186_s10 = smov (!%p269_p9), 24   ;;  %vm553_vm1 = vcmask (!%p269_p9), 1043456   ;;  %vm555_vm2 = vcmask (!%p269_p9), 1045504   ;;  %vm607_vm3 = vcmask (!%p269_p9), 392192   ;;  %vm362_vm4 = vcmask (!%p269_p9), 97280  }
   0xf   : > { %1981 = vmatpush3.bf16.msra.mxu0 (!%p269_p9), %v2062_v1  ;;  %s2188_s19 = smov (!%p269_p9), 104   ;;  %s2189_s20 = smov (!%p269_p9), 92   ;;  %vm366_vm5 = vcmask (!%p269_p9), 195584   ;;  %vm368_vm6 = vcmask (!%p269_p9), 293888   ;;  %vm318_vm7 = vcmask (!%p269_p9), 518144   ;;  %vm727_vm10 = vcmask (!%p269_p9), 255104  }
  0x10   : > { %1982 = vmatprep.subr.bf16.mxu0 (!%p269_p9), %v2063_v10  ;;  %s2190_s22 = smov (!%p269_p9), 36   ;;  %vm319_vm8 = vsmask.f32 (!%p269_p9), 2304  ;;  %s2192_s25 = smov (!%p269_p9), 48   ;;  %vm715_vm11 = vsmask.f32 (!%p269_p9), 2306 }
  0x11   : > { %vm2396_vm9 = vmand (!%p269_p9), %vm318_vm7, %vm319_vm8  ;;  %s2193_s26 = smov (!%p269_p9), 32   ;;  %vm740_vm12 = vcmask (!%p269_p9), 124928   ;;  %vm699_vm14 = vcmask (!%p269_p9), 517504   ;;  %vm714_vm15 = vcmask (!%p269_p9), 387328   ;;  %s2197_s13 = smov (!%p269_p9), 96   ;;  %vm1144_vm7 = vcmask (!%p269_p9), 257024  }
  0x12   : > { %vm2456_vm13 = vmand (!%p269_p9), %vm740_vm12, %vm715_vm11 }
  0x13   : > { %1983 = vmatpush3.bf16.msra.mxu0 (!%p269_p9), %v2063_v10 }
  0x14   : > { %1984 = vmatprep.subr.bf16.mxu0 (!%p269_p9), %v2064_v18 }
  0x15   : > { %s2296_s17 = scalar_select %p307_p10, %s2267_s9, 1 }
  0x17   : > { %s2002_s18 = smul.u32 20, %s2296_s17  ;;  %1985 = vmatpush3.bf16.msra.mxu0 %v2064_v18 }
  0x19   : > { %s2302_s21 = scalar_lea.vmem %s2738_s0, %s2002_s18  ;;  %s2187_s18 = smov 12  }
  0x1a   : > { %v2057_v0 = vld [vmem:[%s2302_s21 + $0x8] ss:$0 sps:$4 sm:$0x77]   ;;  %v2309_v2 = vld [vmem:[%s2302_s21 + $0x4] ss:$0 sps:$4 sm:$0x77]  }
  0x1b   : > { %392 = vrot.lane.b32.xlu1 %v2057_v0, %s2185_s24  ;;  %v343_v3 = vld [vmem:[%s2302_s21] sm:$0x7]  ;;  %v395_v4 = vshrl.u32 %v2057_v0, 16  ;;  %v397_v5 = vshll.u32 %v2057_v0, 16  ;;  %373 = vrot.lane.b32.xlu0 %v2309_v2, %s2185_s24  ;;  %v378_v13 = vshll.u32 %v2309_v2, 16  ;;  %v376_v16 = vshrl.u32 %v2309_v2, 16 }
  0x1c   : > { %v1813_v6 = vcombine.low %v343_v3, %v343_v3  ;;  %v2060_v8 = vld [vmem:[%s2302_s21 + $0xc] ss:$0 sps:$4 sm:$0x77]   ;;  %v529_v19 = vrot.slane %v2309_v2, 6 }
  0x1d   : > { %v399_v7 = vrot.slane %v397_v5, 1  ;;  %v416_v14 = vshll.u32 %v2060_v8, 16  ;;  %v414_v17 = vshrl.u32 %v2060_v8, 16  ;;  %v530_v22 = vrot.slane %v2060_v8, 2 }
  0x1e   : > { %v356_v9 = vshll.u32 %v1813_v6, 16  ;;  %v354_v12 = vshrl.u32 %v1813_v6, 16  ;;  %v552_v23 = vsel %vm549_vm0, %v343_v3, %v529_v19  ;;  %v380_v24 = vrot.slane %v378_v13, 1  ;;  %v2061_v29 = vld [vmem:[%s2302_s21 + $0x10] ss:$0 sps:$4 sm:$0x77]  }
  0x1f   : > { %437 = vrot.lane.b32.xlu1 %v2057_v0, %s2186_s10  ;;  %v400_v11 = vor.u32 %v399_v7, %v395_v4  ;;  %351 = vrot.lane.b32.xlu0 %v1813_v6, %s2185_s24  ;;  %v418_v21 = vrot.slane %v416_v14, 1  ;;  %v554_v25 = vsel %vm553_vm1, %v552_v23, %v2057_v0  ;;  %v516_v30 = vshll.u32 %v2061_v29, 16 }
  0x20   : > { %v358_v15 = vrot.slane %v356_v9, 1  ;;  %v557_v26 = vsel %vm555_vm2, %v554_v25, %v530_v22  ;;  %v381_v28 = vor.u32 %v380_v24, %v376_v16  ;;  %v514_v31 = vshrl.u32 %v2061_v29, 16 }
  0x21   : > { %v419_v27 = vor.u32 %v418_v21, %v414_v17  ;;  %1986 = vmatprep.mubr.msk.bf16.mxu0 %vm607_vm3, %v557_v26  ;;  %v518_v32 = vrot.slane %v516_v30, 1 }
  0x22   : > { %v359_v20 = vor.u32 %v358_v15, %v354_v12 }
  0x23   : > { %401 = vrot.lane.b32.xlu1 %v400_v11, %s2187_s18  ;;  %411 = vrot.lane.b32.xlu0 %v2060_v8, %s2185_s24  ;;  %v519_v33 = vor.u32 %v518_v32, %v514_v31 }
  0x27   : > { %360 = vrot.lane.b32.xlu1 %v359_v20, %s2187_s18  ;;  %435 = vrot.lane.b32.xlu0 %v2309_v2, %s2188_s19 }
  0x2b   : > { %420 = vrot.lane.b32.xlu1 %v419_v27, %s2187_s18  ;;  %382 = vrot.lane.b32.xlu0 %v381_v28, %s2187_s18 }
  0x2f   : > { %479 = vrot.lane.b32.xlu1 %v381_v28, %s2185_s24  ;;  %477 = vrot.lane.b32.xlu0 %v2309_v2, %s2189_s20 }
  0x33   : > { %445 = vrot.lane.b32.xlu1 %v2060_v8, %s2186_s10  ;;  %443 = vrot.lane.b32.xlu0 %v2057_v0, %s2188_s19 }
  0x37   : > { %492 = vrot.lane.b32.xlu1 %v2057_v0, %s2189_s20  ;;  %481 = vrot.lane.b32.xlu0 %v2057_v0, %s2187_s18 }
  0x3b   : > { %427 = vrot.lane.b32.xlu1 %v1813_v6, %s2188_s19  ;;  %494 = vrot.lane.b32.xlu0 %v400_v11, %s2185_s24 }
  0x3f   : > { %451 = vrot.lane.b32.xlu1 %v2060_v8, %s2188_s19  ;;  %429 = vrot.lane.b32.xlu0 %v2309_v2, %s2186_s10  ;;  %s2194_s19 = smov 64  }
  0x43   : > { %462 = vrot.lane.b32.xlu1 %v1813_v6, %s2189_s20  ;;  %456 = vrot.lane.b32.xlu0 %v2061_v29, %s2186_s10 }
  0x47   : > { %483 = vrot.lane.b32.xlu1 %v400_v11, %s2190_s22  ;;  %464 = vrot.lane.b32.xlu0 %v359_v20, %s2185_s24 }
  0x4b   : > { %507 = vrot.lane.b32.xlu1 %v2060_v8, %s2189_s20  ;;  %496 = vrot.lane.b32.xlu0 %v2060_v8, %s2187_s18 }
  0x4f   : > { %466 = vrot.lane.b32.xlu1 %v2309_v2, %s2187_s18  ;;  %509 = vrot.lane.b32.xlu0 %v419_v27, %s2185_s24  ;;  %s2191_s24 = smov 16  }
  0x53   : > { %511 = vrot.lane.b32.xlu1 %v2061_v29, %s2187_s18  ;;  %498 = vrot.lane.b32.xlu0 %v419_v27, %s2190_s22 }
  0x57   : > { %520 = vrot.lane.b32.xlu1 %v519_v33, %s2190_s22  ;;  %468 = vrot.lane.b32.xlu0 %v381_v28, %s2190_s22  ;;  %s297_s22 = sand.u32 1, %s2175_s28  }
  0x58   : > { %s2688_s10 = scalar_lea.sflag [#allocation5], %s297_s22 }
  0x8d   : > { %v393_v34 = vpop.permute.xlu1 %392  ;;  %v374_v35 = vpop.permute.xlu0 %373 }
  0x91   : > { %v438_v36 = vpop.permute.xlu1 %437  ;;  %v352_v37 = vpop.permute.xlu0 %351 }
  0x95   : > { %v402_v38 = vpop.permute.xlu1 %401  ;;  %v412_v39 = vpop.permute.xlu0 %411 }
  0x96   : > { %v405_v41 = vsel %vm362_vm4, %v393_v34, %v402_v38 }
  0x97   : > { %v406_v43 = vsel %vm366_vm5, %v405_v41, %v393_v34 }
  0x98   : > { %v407_v50 = vsel %vm368_vm6, %v406_v43, %v402_v38 }
  0x99   : > { %v361_v40 = vpop.permute.xlu1 %360  ;;  %v436_v42 = vpop.permute.xlu0 %435  ;;  %v534_v58 = vrot.slane %v407_v50, 4 }
  0x9a   : > { %v365_v44 = vsel %vm362_vm4, %v352_v37, %v361_v40  ;;  %v441_v6 = vsel %vm366_vm5, %v436_v42, %v438_v36 }
  0x9b   : > { %v367_v51 = vsel %vm366_vm5, %v365_v44, %v352_v37  ;;  %v442_v8 = vsel %vm368_vm6, %v441_v6, %v438_v36 }
  0x9c   : > { %v369_v59 = vsel %vm368_vm6, %v367_v51, %v361_v40  ;;  %v538_v13 = vrot.slane %v442_v8, 6 }
  0x9d   : > { %v421_v45 = vpop.permute.xlu1 %420  ;;  %v383_v46 = vpop.permute.xlu0 %382 }
  0x9e   : > { %v424_v47 = vsel %vm362_vm4, %v412_v39, %v421_v45  ;;  %v386_v48 = vsel %vm362_vm4, %v374_v35, %v383_v46 }
  0x9f   : > { %v425_v49 = vsel %vm366_vm5, %v424_v47, %v412_v39  ;;  %v387_v52 = vsel %vm366_vm5, %v386_v48, %v374_v35 }
  0xa0   : > { %v388_v53 = vsel %vm368_vm6, %v387_v52, %v383_v46  ;;  %v426_v54 = vsel %vm368_vm6, %v425_v49, %v421_v45  ;;  %v324_v52 = vld [vmem:[#allocation2 + $0x4] sm:$0x7] }
  0xa1   : > { %v480_v55 = vpop.permute.xlu1 %479  ;;  %v532_v56 = vrot.slane %v388_v53, 6  ;;  %v478_v57 = vpop.permute.xlu0 %477  ;;  %v536_v61 = vrot.slane %v426_v54, 2  ;;  %v325_v54 = vsel %vm2396_vm9, 0, %v324_v52  ;;  %v2074_v52 = vld [vmem:[%s2741_s3 + $0x50] sm:$0xff]  }
  0xa2   : > { %v487_v30 = vsel %vm362_vm4, %v478_v57, %v480_v55  ;;  %326 = vst [vmem:[#allocation2 + $0x4] sm:$0x7] %v325_v54  ;;  %v2075_v53 = vld [vmem:[%s2741_s3 + $0x10] sm:$0xff]   ;;  %v2076_v54 = vld [vmem:[%s2741_s3 + $0x58] sm:$0xff]  }
  0xa3   : > { %v559_v60 = vsel %vm549_vm0, %v369_v59, %v532_v56  ;;  %v1818_v59 = vld [vmem:[%s2740_s2] ss:$0 sm:$0xff] }
  0xa4   : > { %v561_v63 = vsel %vm553_vm1, %v559_v60, %v534_v58  ;;  %v327_v60 = vld [vmem:[#allocation2 + $0x8] sm:$0x7] }
  0xa5   : > { %v446_v62 = vpop.permute.xlu1 %445  ;;  %v444_v0 = vpop.permute.xlu0 %443  ;;  %v563_v1 = vsel %vm555_vm2, %v561_v63, %v536_v61  ;;  %v328_v61 = vsel %vm2396_vm9, 0, %v327_v60  ;;  %v330_v63 = vld [vmem:[#allocation2 + $0xc] sm:$0x7] }
  0xa6   : > { %1987 = vmatmul.mubr.msk.bf16.vlgmr.msra.gmra.mrb[0].mxu0 %vm607_vm3, %v563_v1  ;;  %v449_v9 = vsel %vm366_vm5, %v444_v0, %v446_v62  ;;  %329 = vst [vmem:[#allocation2 + $0x8] sm:$0x7] %v328_v61  ;;  %v331_v1 = vsel %vm2396_vm9, 0, %v330_v63 }
  0xa7   : > { %v450_v14 = vsel %vm368_vm6, %v449_v9, %v446_v62  ;;  %332 = vst [vmem:[#allocation2 + $0xc] sm:$0x7] %v331_v1 }
  0xa8   : > { %v540_v19 = vrot.slane %v450_v14, 4  ;;  %v321_v14 = vld [vmem:[#allocation2] sm:$0x7] }
  0xa9   : > { %v493_v2 = vpop.permute.xlu1 %492  ;;  %v482_v3 = vpop.permute.xlu0 %481 }
  0xaa   : > { %v489_v32 = vsel %vm366_vm5, %v487_v30, %v482_v3 }
  0xad   : > { %v428_v4 = vpop.permute.xlu1 %427  ;;  %v495_v5 = vpop.permute.xlu0 %494 }
  0xae   : > { %v502_v33 = vsel %vm362_vm4, %v493_v2, %v495_v5 }
  0xb1   : > { %v452_v7 = vpop.permute.xlu1 %451  ;;  %v430_v10 = vpop.permute.xlu0 %429 }
  0xb2   : > { %v433_v11 = vsel %vm366_vm5, %v428_v4, %v430_v10 }
  0xb3   : > { %v434_v12 = vsel %vm368_vm6, %v433_v11, %v430_v10 }
  0xb4   : > { %v565_v17 = vsel %vm549_vm0, %v434_v12, %v538_v13 }
  0xb5   : > { %v463_v15 = vpop.permute.xlu1 %462  ;;  %v457_v16 = vpop.permute.xlu0 %456  ;;  %v567_v24 = vsel %vm553_vm1, %v565_v17, %v540_v19 }
  0xb6   : > { %v460_v18 = vsel %vm366_vm5, %v452_v7, %v457_v16 }
  0xb7   : > { %v461_v20 = vsel %vm368_vm6, %v460_v18, %v457_v16  ;;  %v322_v18 = vsel %vm2396_vm9, 0, %v321_v14 }
  0xb8   : > { %v542_v21 = vrot.slane %v461_v20, 2  ;;  %323 = vst [vmem:[#allocation2] sm:$0x7] %v322_v18  ;;  %v333_v20 = vld [vmem:[#allocation2 + $0x10] sm:$0x7] }
  0xb9   : > { %v484_v22 = vpop.permute.xlu1 %483  ;;  %v465_v23 = vpop.permute.xlu0 %464 }
  0xba   : > { %v569_v25 = vsel %vm555_vm2, %v567_v24, %v542_v21  ;;  %v491_v35 = vsel %vm368_vm6, %v489_v32, %v484_v22  ;;  %v472_v39 = vsel %vm362_vm4, %v463_v15, %v465_v23  ;;  %v334_v24 = vsel %vm2396_vm9, 0, %v333_v20 }
  0xbb   : > { %1990 = vmatprep.mubr.msk.bf16.mxu0 %vm607_vm3, %v569_v25  ;;  %v544_v42 = vrot.slane %v491_v35, 6  ;;  %335 = vst [vmem:[#allocation2 + $0x10] sm:$0x7] %v334_v24  ;;  %vm1260_vm9 = vcmask 261120  }
  0xbd   : > { %v508_v26 = vpop.permute.xlu1 %507  ;;  %v497_v27 = vpop.permute.xlu0 %496 }
  0xbe   : > { %v504_v36 = vsel %vm366_vm5, %v502_v33, %v497_v27 }
  0xc1   : > { %v467_v28 = vpop.permute.xlu1 %466  ;;  %v510_v29 = vpop.permute.xlu0 %509 }
  0xc2   : > { %v524_v37 = vsel %vm362_vm4, %v508_v26, %v510_v29  ;;  %v474_v43 = vsel %vm366_vm5, %v472_v39, %v467_v28  ;;  %vm876_vm4 = vcmask 523264  }
  0xc5   : > { %v512_v31 = vpop.permute.xlu1 %511  ;;  %v499_v34 = vpop.permute.xlu0 %498 }
  0xc6   : > { %v506_v38 = vsel %vm368_vm6, %v504_v36, %v499_v34  ;;  %v526_v40 = vsel %vm366_vm5, %v524_v37, %v512_v31  ;;  %vm336_vm5 = vcmask 256000  }
  0xc7   : > { %v546_v46 = vrot.slane %v506_v38, 4  ;;  %vm2549_vm8 = vmand %vm336_vm5, %vm715_vm11 }
  0xc9   : > { %v521_v41 = vpop.permute.xlu1 %520  ;;  %v469_v44 = vpop.permute.xlu0 %468 }
  0xca   : > { %v528_v45 = vsel %vm368_vm6, %v526_v40, %v521_v41  ;;  %v476_v47 = vsel %vm368_vm6, %v474_v43, %v469_v44  ;;  %vm2198_vm6 = vmmov 0  }
  0xcb   : > { %v548_v48 = vrot.slane %v528_v45, 2  ;;  %v571_v49 = vsel %vm549_vm0, %v476_v47, %v544_v42 }
  0xcc   : > { %v573_v50 = vsel %vm553_vm1, %v571_v49, %v546_v46  ;;  %v2071_v49 = vld [vmem:[%s2741_s3] sm:$0xff]  }
  0xcd   : > { %v575_v51 = vsel %vm555_vm2, %v573_v50, %v548_v48  ;;  %v2070_v48 = vld [vmem:[%s2741_s3 + $0x40] sm:$0xff]   ;;  %v2072_v50 = vld [vmem:[%s2741_s3 + $0x48] sm:$0xff]  }
  0xce   : > { %1991 = vmatmul.mubr.msk.bf16.gmra.mrb[4].mxu0 %vm607_vm3, %v575_v51  ;;  %1933 = vmatprep.subr.bf16.mxu1 %v2070_v48  ;;  %v2073_v51 = vld [vmem:[%s2741_s3 + $0x8] sm:$0xff]   ;;  %vm2472_vm3 = vmand %vm714_vm15, %vm715_vm11 }
  0xcf   : > { %1934 = vmatpush3.bf16.msra.mxu1 %v2071_v49 }
  0xd0   : > { %1935 = vmatprep.subr.bf16.mxu1 %v2072_v50 }
  0xd3   : > { %1936 = vmatpush3.bf16.msra.mxu1 %v2073_v51 }
  0xd4   : > { %1937 = vmatprep.subr.bf16.mxu1 %v2074_v52 }
  0xd7   : > { %1938 = vmatpush3.bf16.msra.mxu1 %v2075_v53 }
  0xd8   : > { %1939 = vmatprep.subr.bf16.mxu1 %v2076_v54 }
 0x179   : > { %v1988_v55 = vpop.f32.mrb[0].mxu0 }
 0x17a   : > { %v650_v56 = vpop.f32.mrb[1].mxu0  ;;  %v659_v62 = vadd.f32 %v1988_v55, %v1818_v59  ;;  %v2077_v55 = vld [vmem:[%s2741_s3 + $0x18] sm:$0xff]  }
 0x17b   : > { %v1989_v57 = vpop.f32.mrb[2].mxu0  ;;  %v651_v8 = vadd.f32 %v1818_v59, %v650_v56  ;;  %v2078_v56 = vld [vmem:[%s2741_s3 + $0x60] sm:$0xff]   ;;  %1940 = vmatpush3.bf16.msra.mxu1 %v2077_v55 }
 0x17c   : > { %v653_v58 = vpop.f32.mrb[3].mxu0  ;;  %v683_v4 = vmax.f32 %v659_v62, 0.0  ;;  %v662_v11 = vadd.f32 %v1989_v57, %v1818_v59  ;;  %v2079_v57 = vld [vmem:[%s2741_s3 + $0x20] sm:$0xff]   ;;  %1941 = vmatprep.subr.bf16.mxu1 %v2078_v56 }
 0x17d   : > { %v654_v5 = vadd.f32 %v1818_v59, %v653_v58  ;;  %v681_v19 = vmax.f32 %v651_v8, 0.0 }
 0x17e   : > { %v1909_v15 = vpack.c.bf16 %v683_v4, %v683_v4  ;;  %v684_v21 = vmax.f32 %v662_v11, 0.0 }
 0x17f   : > { %v682_v16 = vmax.f32 %v654_v5, 0.0  ;;  %v1908_v28 = vpack.c.bf16 %v681_v19, %v681_v19  ;;  %1942 = vmatpush3.bf16.msra.mxu1 %v2079_v57 }
 0x180   : > { %v705_v25 = vshrl.u32 %v1909_v15, 16  ;;  %v708_v26 = vshll.u32 %v1909_v15, 16  ;;  %v1913_v29 = vpack.c.bf16 %v684_v21, %v684_v21 }
 0x181   : > { %v1912_v27 = vpack.c.bf16 %v682_v16, %v682_v16  ;;  %v1830_v34 = vrot.slane %v1908_v28, 10 }
 0x182   : > { %v751_v31 = vrot.slane %v705_v25, 5  ;;  %v752_v32 = vrot.slane %v708_v26, 6  ;;  %v785_v35 = vshrl.u32 %v1913_v29, 16  ;;  %v788_v36 = vshll.u32 %v1913_v29, 16 }
 0x183   : > { %v1836_v33 = vrot.slane %v1912_v27, 10  ;;  %v707_v42 = vrot.slane %v705_v25, 7 }
 0x184   : > { %v753_v37 = vor.u32 %v752_v32, %v751_v31  ;;  %v787_v38 = vrot.slane %v785_v35, 7  ;;  %v823_v39 = vrot.slane %v785_v35, 5  ;;  %v824_v40 = vrot.slane %v788_v36, 6 }
 0x185   : > { %v710_v46 = vor.u32 %v708_v26, %v707_v42 }
 0x186   : > { %v754_v43 = vrot.slane %v753_v37, 4  ;;  %v790_v44 = vor.u32 %v788_v36, %v787_v38  ;;  %v825_v45 = vor.u32 %v824_v40, %v823_v39 }
 0x188   : > { %v826_v47 = vrot.slane %v825_v45, 4  ;;  %v2081_v45 = vld [vmem:[%s2741_s3 + $0x28] sm:$0xff]  }
 0x1a1   : > { %v1992_v0 = vpop.f32.mrb[4].mxu0 }
 0x1a2   : > { %v2409_v2 = vadd.f32 %v1992_v0, %v1818_v59  ;;  %v666_v3 = vpop.f32.mrb[5].mxu0 }
 0x1a3   : > { %v667_v6 = vadd.f32 %v1818_v59, %v666_v3  ;;  %v1993_v7 = vpop.f32.mrb[6].mxu0 }
 0x1a4   : > { %v2411_v9 = vadd.f32 %v1993_v7, %v1818_v59  ;;  %v669_v10 = vpop.f32.mrb[7].mxu0  ;;  %v687_v58 = vmax.f32 %v2409_v2, 0.0 }
 0x1a5   : > { %v685_v12 = vmax.f32 %v667_v6, 0.0  ;;  %v670_v13 = vadd.f32 %v1818_v59, %v669_v10 }
 0x1a6   : > { %v1911_v59 = vpack.c.bf16 %v687_v58, %v687_v58  ;;  %v688_v62 = vmax.f32 %v2411_v9, 0.0 }
 0x1a7   : > { %v1910_v17 = vpack.c.bf16 %v685_v12, %v685_v12  ;;  %v686_v23 = vmax.f32 %v670_v13, 0.0 }
 0x1a8   : > { %v733_v60 = vshrl.u32 %v1911_v59, 16  ;;  %v736_v61 = vshll.u32 %v1911_v59, 16  ;;  %v1915_v3 = vpack.c.bf16 %v688_v62, %v688_v62  ;;  %v2082_v59 = vld [vmem:[%s2741_s3 + $0x70] sm:$0xff]  }
 0x1a9   : > { %v1831_v22 = vrot.slane %v1910_v17, 10  ;;  %723 = vrot.lane.b32.xlu1 %v1910_v17, %s2191_s24  ;;  %v1914_v30 = vpack.c.bf16 %v686_v23, %v686_v23  ;;  %v2083_v62 = vld [vmem:[%s2741_s3 + $0x30] sm:$0xff]  }
 0x1aa   : > { %v768_v0 = vrot.slane %v733_v60, 5  ;;  %v769_v1 = vrot.slane %v736_v61, 6  ;;  %v735_v5 = vrot.slane %v733_v60, 7  ;;  %v807_v7 = vshrl.u32 %v1915_v3, 16 }
 0x1ab   : > { %763 = vrot.lane.b32.xlu0 %v1831_v22, %s2191_s24  ;;  %v1837_v41 = vrot.slane %v1914_v30, 10  ;;  %v810_v15 = vshll.u32 %v1915_v3, 16  ;;  %v2084_v3 = vld [vmem:[%s2741_s3 + $0x78] sm:$0xff]  }
 0x1ac   : > { %v770_v2 = vor.u32 %v769_v1, %v768_v0  ;;  %v738_v10 = vor.u32 %v736_v61, %v735_v5  ;;  %v809_v14 = vrot.slane %v807_v7, 7  ;;  %v840_v22 = vrot.slane %v807_v7, 5  ;;  %v2085_v5 = vld [vmem:[%s2741_s3 + $0x38] sm:$0xff]  }
 0x1ad   : > { %778 = vrot.lane.b32.xlu1 %v1912_v27, %s2192_s25  ;;  %v841_v23 = vrot.slane %v810_v15, 6 }
 0x1ae   : > { %v771_v13 = vrot.slane %v770_v2, 4  ;;  %v812_v21 = vor.u32 %v810_v15, %v809_v14 }
 0x1af   : > { %799 = vrot.lane.b32.xlu0 %v1914_v30, %s2191_s24  ;;  %v842_v29 = vor.u32 %v841_v23, %v840_v22 }
 0x1b1   : > { %819 = vrot.lane.b32.xlu1 %v1836_v33, %s2192_s25  ;;  %v843_v36 = vrot.slane %v842_v29, 4 }
 0x1b3   : > { %747 = vrot.lane.b32.xlu0 %v1830_v34, %s2192_s25 }
 0x1b5   : > { %696 = vrot.lane.b32.xlu1 %v1908_v28, %s2192_s25 }
 0x1b7   : > { %835 = vrot.lane.b32.xlu0 %v1837_v41, %s2191_s24  ;;  %s1809_s24 = sshll.u32 %s297_s22, 3 }
 0x1b8   : > { %s2543_s25 = scalar_lea.vmem [#allocation4], %s1809_s24 }
 0x1b9   : > { %755 = vrot.lane.b32.xlu1 %v754_v43, %s2193_s26  ;;  %s1715_s24 = sshll.u32 %s2543_s25, 4  ;;  %s2684_s24 = int_to_ptr.vmem [resolvable:$true] %s1715_s24 }
 0x1ba   : > { %s2121_s12 = scalar_lea.vmem %s2684_s24, 128 }
 0x1bb   : > { %791 = vrot.lane.b32.xlu0 %v790_v44, %s2193_s26  ;;  %v2080_v44 = vld [vmem:[%s2741_s3 + $0x68] sm:$0xff]   ;;  %p2122_p11 = scmp.ne.s32.totalorder %s2684_s24, %s2121_s12 }
 0x1bc   : > { %1943 = vmatprep.subr.bf16.mxu1 %v2080_v44 }
 0x1bd   : > { %711 = vrot.lane.b32.xlu1 %v710_v46, %s2193_s26  ;;  %1944 = vmatpush3.bf16.msra.mxu1 %v2081_v45  ;;  %p2123_p12 = pnand %p2122_p11, %p2284_p5 }
 0x1be   : > { %1945 = vmatprep.subr.bf16.mxu1 %v2082_v59 }
 0x1bf   : > { %827 = vrot.lane.b32.xlu0 %v826_v47, %s2193_s26  ;;  %p2124_p13 = pneg %p2123_p12 }
 0x1c1   : > { %1946 = vmatpush3.bf16.msra.mxu1 %v2083_v62 }
 0x1c2   : > { %1947 = vmatprep.subr.bf16.mxu1 %v2084_v3 }
 0x1c5   : > { %1948 = vmatpush3.bf16.msra.mxu1 %v2085_v5 }
 0x21b   : > { %v724_v63 = vpop.permute.xlu1 %723 }
 0x21c   : > { %728 = vst.msk [vmem:[#allocation2 + $0x4] sm:$0x3] %vm727_vm10, %v724_v63 }
 0x21d   : > { %v764_v4 = vpop.permute.xlu0 %763 }
 0x21e   : > { %767 = vst.msk [vmem:[#allocation2 + $0x8] sm:$0x3] %vm727_vm10, %v764_v4 }
 0x21f   : > { %v779_v6 = vpop.permute.xlu1 %778 }
 0x221   : > { %v800_v9 = vpop.permute.xlu0 %799 }
 0x222   : > { %803 = vst.msk [vmem:[#allocation2 + $0xc] sm:$0x3] %vm727_vm10, %v800_v9 }
 0x223   : > { %v820_v11 = vpop.permute.xlu1 %819  ;;  %v742_v12 = vld [vmem:[#allocation2 + $0x4] sm:$0x7] }
 0x224   : > { %v743_v16 = vsel %vm2456_vm13, %v738_v10, %v742_v12 }
 0x225   : > { %v773_v17 = vld [vmem:[#allocation2 + $0x8] sm:$0x7]  ;;  %744 = vst [vmem:[#allocation2 + $0x4] sm:$0x7] %v743_v16  ;;  %v748_v18 = vpop.permute.xlu0 %747 }
 0x226   : > { %v774_v19 = vsel %vm2456_vm13, %v771_v13, %v773_v17  ;;  %750 = vst.msk [vmem:[#allocation2 + $0x4] sm:$0x3] %vm699_vm14, %v748_v18 }
 0x227   : > { %775 = vst [vmem:[#allocation2 + $0x8] sm:$0x7] %v774_v19  ;;  %v697_v20 = vpop.permute.xlu1 %696 }
 0x228   : > { %781 = vst.msk [vmem:[#allocation2 + $0x8] sm:$0x3] %vm699_vm14, %v779_v6  ;;  %700 = vst.msk [vmem:[#allocation2] sm:$0x3] %vm699_vm14, %v697_v20 }
 0x229   : > { %v814_v24 = vld [vmem:[#allocation2 + $0xc] sm:$0x7]  ;;  %v836_v25 = vpop.permute.xlu0 %835 }
 0x22a   : > { %v815_v26 = vsel %vm2456_vm13, %v812_v21, %v814_v24  ;;  %839 = vst.msk [vmem:[#allocation2 + $0x10] sm:$0x3] %vm727_vm10, %v836_v25  ;;  %vm1266_vm10 = vcmask 785408  }
 0x22b   : > { %816 = vst [vmem:[#allocation2 + $0xc] sm:$0x7] %v815_v26  ;;  %v756_v28 = vpop.permute.xlu1 %755 }
 0x22c   : > { %822 = vst.msk [vmem:[#allocation2 + $0xc] sm:$0x3] %vm699_vm14, %v820_v11 }
 0x22d   : > { %v758_v30 = vld [vmem:[#allocation2 + $0x4] sm:$0x7]  ;;  %v792_v31 = vpop.permute.xlu0 %791 }
 0x22e   : > { %v759_v32 = vsel %vm2472_vm3, %v756_v28, %v758_v30 }
 0x22f   : > { %760 = vst [vmem:[#allocation2 + $0x4] sm:$0x7] %v759_v32  ;;  %v794_v33 = vld [vmem:[#allocation2 + $0x8] sm:$0x7]  ;;  %v717_v34 = vld [vmem:[#allocation2] sm:$0x7]  ;;  %v712_v35 = vpop.permute.xlu1 %711 }
 0x230   : > { %v795_v37 = vsel %vm2472_vm3, %v792_v31, %v794_v33  ;;  %v718_v38 = vsel %vm2472_vm3, %v712_v35, %v717_v34 }
 0x231   : > { %v845_v39 = vld [vmem:[#allocation2 + $0x10] sm:$0x7]  ;;  %796 = vst [vmem:[#allocation2 + $0x8] sm:$0x7] %v795_v37  ;;  %719 = vst [vmem:[#allocation2] sm:$0x7] %v718_v38  ;;  %v828_v42 = vpop.permute.xlu0 %827 }
 0x232   : > { %v846_v40 = vsel %vm2456_vm13, %v843_v36, %v845_v39  ;;  %v2195_v38 = vmov 0  }
 0x233   : > { %847 = vst [vmem:[#allocation2 + $0x10] sm:$0x7] %v846_v40  ;;  %v830_v41 = vld [vmem:[#allocation2 + $0xc] sm:$0x7]  ;;  %337 = vst.msk [vmem:[#allocation3] sm:$0x7] %vm336_vm5, %v2195_v38 }
 0x234   : > { %v831_v43 = vsel %vm2472_vm3, %v828_v42, %v830_v41  ;;  %338 = vst.msk [vmem:[#allocation3 + $0x4] sm:$0x7] %vm336_vm5, %v2195_v38  ;;  %339 = vst.msk [vmem:[#allocation3 + $0x8] sm:$0x7] %vm336_vm5, %v2195_v38 }
 0x235   : > { %832 = vst [vmem:[#allocation2 + $0xc] sm:$0x7] %v831_v43  ;;  %340 = vst.msk [vmem:[#allocation3 + $0xc] sm:$0x7] %vm336_vm5, %v2195_v38 }
 0x236   : > { %v2065_v46 = vld [vmem:[#allocation2 + $0x4] ss:$0 sps:$4 sm:$0x77]   ;;  %341 = vst.msk [vmem:[#allocation3 + $0x10] sm:$0x7] %vm336_vm5, %v2195_v38 }
 0x237   : > { %v870_v47 = vshll.u32 %v2065_v46, 16  ;;  %v868_v48 = vshrl.u32 %v2065_v46, 16  ;;  %v850_v18 = vld [vmem:[#allocation2 + $0x4] sm:$0x3]  ;;  %342 = vst.msk [vmem:[#allocation3 + $0x14] sm:$0x7] %vm336_vm5, %v2195_v38 }
 0x238   : > { %v2066_v49 = vld [vmem:[#allocation2 + $0x8] ss:$0 sps:$4 sm:$0x77]   ;;  %v2069_v53 = vld [vmem:[#allocation2] ss:$0 sps:$4 sm:$0x77]  }
 0x239   : > { %v872_v50 = vrot.slane %v870_v47, 1  ;;  %v891_v52 = vshll.u32 %v2066_v49, 16  ;;  %v889_v56 = vshrl.u32 %v2066_v49, 16  ;;  %v858_v1 = vshll.u32 %v2069_v53, 16  ;;  %v883_v12 = vld [vmem:[#allocation2 + $0x8] sm:$0x3] }
 0x23a   : > { %v2067_v51 = vld [vmem:[#allocation2 + $0x10] ss:$0 sps:$4 sm:$0x77]   ;;  %v856_v9 = vshrl.u32 %v2069_v53, 16  ;;  %v848_v28 = vld [vmem:[#allocation2] sm:$0x3] }
 0x23b   : > { %v873_v54 = vor.u32 %v872_v50, %v868_v48  ;;  %v925_v55 = vshll.u32 %v2067_v51, 16  ;;  %v893_v57 = vrot.slane %v891_v52, 1  ;;  %v923_v60 = vshrl.u32 %v2067_v51, 16  ;;  %v917_v17 = vld [vmem:[#allocation2 + $0x10] sm:$0x3]  ;;  %v2092_v53 = vld [vmem:[%s2743_s5 + $0x80] sm:$0xff]  }
 0x23c   : > { %v2068_v58 = vld [vmem:[#allocation2 + $0xc] ss:$0 sps:$4 sm:$0x77]   ;;  %v860_v8 = vrot.slane %v858_v1, 1  ;;  %v2196_v47 = vmov 0.0  }
 0x23d   : > { %874 = vrot.lane.b32.xlu1 %v873_v54, %s2194_s19  ;;  %v927_v61 = vrot.slane %v925_v55, 1  ;;  %v894_v63 = vor.u32 %v893_v57, %v889_v56  ;;  %v908_v0 = vshll.u32 %v2068_v58, 16  ;;  %v906_v6 = vshrl.u32 %v2068_v58, 16  ;;  %v900_v20 = vld [vmem:[#allocation2 + $0xc] sm:$0x3]  ;;  %1994 = vmatprep.subr.bf16.mxu1 %v2196_v47 }
 0x23e   : > { %v861_v10 = vor.u32 %v860_v8, %v856_v9  ;;  %v2086_v39 = vld [vmem:[#allocation3] ss:$0 sps:$4 sm:$0x77]   ;;  %v2089_v46 = vld [vmem:[#allocation3 + $0x14] ss:$0 sps:$4 sm:$0x77]  }
 0x23f   : > { %v928_v4 = vor.u32 %v927_v61, %v923_v60  ;;  %895 = vrot.lane.b32.xlu0 %v894_v63, %s2194_s19  ;;  %v910_v2 = vrot.slane %v908_v0, 1  ;;  %v1206_v40 = vshll.u32 %v2086_v39, 16  ;;  %v1204_v41 = vshrl.u32 %v2086_v39, 16  ;;  %v2087_v43 = vld [vmem:[#allocation3] ss:$0 sps:$4 sm:$0x66]  }
 0x240   : > { %v1215_v45 = vrot.slane %v2087_v43, 1  ;;  %v2088_v48 = vld [vmem:[#allocation3 + $0x14] ss:$0 sps:$4 sm:$0x33]   ;;  %v1389_v49 = vshrl.u32 %v2089_v46, 16  ;;  %v1391_v50 = vshll.u32 %v2089_v46, 16 }
 0x241   : > { %929 = vrot.lane.b32.xlu1 %v928_v4, %s2194_s19  ;;  %v911_v7 = vor.u32 %v910_v2, %v906_v6  ;;  %v1208_v42 = vrot.slane %v1206_v40, 1  ;;  %v2094_v54 = vld [vmem:[%s2743_s5 + $0x88] sm:$0xff]   ;;  %v1843_v56 = vld [vmem:[%s2742_s4] ss:$0 sm:$0xff] }
 0x242   : > { %v1393_v51 = vrot.slane %v1391_v50, 1 }
 0x243   : > { %912 = vrot.lane.b32.xlu0 %v911_v7, %s2194_s19  ;;  %v1209_v44 = vor.u32 %v1208_v42, %v1204_v41 }
 0x244   : > { %v1394_v52 = vor.u32 %v1393_v51, %v1389_v49  ;;  %v2107_v49 = vld [vmem:[%s2743_s5 + $0x48] sm:$0xff]  }
 0x245   : > { %1210 = vrot.lane.b32.xlu1 %v1209_v44, %s2193_s26  ;;  %v2108_v51 = vld [vmem:[%s2743_s5 + $0x8] sm:$0xff]  }
 0x247   : > { %862 = vrot.lane.b32.xlu0 %v861_v10, %s2194_s19 }
 0x249   : > { %1383 = vrot.lane.b32.xlu1 %v2088_v48, %s2194_s19 }
 0x24b   : > { %1216 = vrot.lane.b32.xlu0 %v1215_v45, %s2194_s19 }
 0x24f   : > { %1395 = vrot.lane.b32.xlu0 %v1394_v52, %s2197_s13  ;;  %v2109_v52 = vld [vmem:[%s2743_s5 + $0x50] sm:$0xff]  }
 0x2af   : > { %v875_v11 = vpop.permute.xlu1 %874 }
 0x2b0   : > { %v882_v22 = vsel %vm876_vm4, %v850_v18, %v875_v11  ;;  %v1158_v11 = vld [vmem:[#allocation3 + $0x4] sm:$0x7]  ;;  %v1179_v18 = vld [vmem:[#allocation3 + $0xc] sm:$0x7] }
 0x2b1   : > { %v896_v13 = vpop.permute.xlu0 %895  ;;  %v936_v27 = vrot.slane %v882_v22, 6 }
 0x2b2   : > { %v899_v14 = vsel %vm876_vm4, %v883_v12, %v896_v13 }
 0x2b3   : > { %v930_v15 = vpop.permute.xlu1 %929  ;;  %v937_v16 = vrot.slane %v899_v14, 6  ;;  %v939_v31 = vrot.slane %v899_v14, 4 }
 0x2b4   : > { %v933_v19 = vsel %vm876_vm4, %v917_v17, %v930_v15  ;;  %v1167_v17 = vld [vmem:[#allocation3 + $0x8] sm:$0x7] }
 0x2b5   : > { %v913_v21 = vpop.permute.xlu0 %912  ;;  %v943_v25 = vrot.slane %v933_v19, 2  ;;  %v947_v26 = vsel %vm549_vm0, %v882_v22, %v937_v16 }
 0x2b6   : > { %v916_v23 = vsel %vm876_vm4, %v900_v20, %v913_v21 }
 0x2b7   : > { %v940_v24 = vrot.slane %v916_v23, 4  ;;  %v942_v34 = vrot.slane %v916_v23, 2 }
 0x2b9   : > { %v863_v29 = vpop.permute.xlu0 %862  ;;  %v951_v30 = vsel %vm553_vm1, %v947_v26, %v940_v24  ;;  %v1188_v26 = vld [vmem:[#allocation3 + $0x10] sm:$0x7] }
 0x2ba   : > { %v879_v32 = vsel %vm876_vm4, %v848_v28, %v863_v29  ;;  %v956_v33 = vsel %vm555_vm2, %v951_v30, %v943_v25  ;;  %v2105_v29 = vld [vmem:[%s2743_s5 + $0x40] sm:$0xff]  }
 0x2bb   : > { %v945_v35 = vsel %vm549_vm0, %v879_v32, %v936_v27  ;;  %1125 = vmatprep.mubr.bf16.mxu1 %v956_v33  ;;  %v2106_v30 = vld [vmem:[%s2743_s5] sm:$0xff]   ;;  %1955 = vmatprep.subr.bf16.mxu0 %v2105_v29 }
 0x2bc   : > { %v949_v36 = vsel %vm553_vm1, %v945_v35, %v939_v31  ;;  %v2098_v35 = vld [vmem:[#allocation3 + $0x14] ss:$0 sps:$4 sm:$0x66]   ;;  %1956 = vmatpush3.bf16.msra.mxu0 %v2106_v30 }
 0x2bd   : > { %v953_v37 = vsel %vm555_vm2, %v949_v36, %v942_v34  ;;  %v1879_v45 = vrot.slane %v2098_v35, 3  ;;  %1957 = vmatprep.subr.bf16.mxu0 %v2107_v49 }
 0x2be   : > { %1126 = vmatmul.mubr.bf16.vlgmr.msra.gmra.mrb[0].mxu1 %v953_v37 }
 0x2bf   : > { %1995 = vmatpush3.bf16.msra.mxu1 %v2092_v53  ;;  %1998 = vmatprep.mubr.msk.bf16.mxu1 %vm2198_vm6, %v2196_v47 }
 0x2c0   : > { %1996 = vmatprep.subr.bf16.mxu1 %v2196_v47  ;;  %1958 = vmatpush3.bf16.msra.mxu0 %v2108_v51 }
 0x2c1   : > { %1959 = vmatprep.subr.bf16.mxu0 %v2109_v52  ;;  %v1191_v52 = vld [vmem:[#allocation3] sm:$0x3] }
 0x2c3   : > { %1997 = vmatpush3.bf16.msra.mxu1 %v2094_v54 }
 0x391   : > { %v1949_v55 = vpop.f32.mrb[0].mxu1 }
 0x392   : > { %v1950_v57 = vpop.f32.mrb[1].mxu1 }
 0x393   : > { %v1951_v58 = vadd.f32 %v1950_v57, %v1949_v55  ;;  %v1952_v59 = vpop.f32.mrb[2].mxu1  ;;  %v2110_v55 = vld [vmem:[%s2743_s5 + $0x10] sm:$0xff]   ;;  %v2111_v57 = vld [vmem:[%s2743_s5 + $0x58] sm:$0xff]  }
 0x394   : > { %v1953_v60 = vpop.f32.mrb[3].mxu1  ;;  %1960 = vmatpush3.bf16.msra.mxu0 %v2110_v55 }
 0x395   : > { %v1128_v61 = vadd.f32 %v1951_v58, %v1843_v56  ;;  %v1954_v62 = vadd.f32 %v1953_v60, %v1952_v59  ;;  %v2112_v60 = vld [vmem:[%s2743_s5 + $0x18] sm:$0xff]   ;;  %1961 = vmatprep.subr.bf16.mxu0 %v2111_v57 }
 0x397   : > { %v1134_v63 = vmax.f32 %v1128_v61, 0.0  ;;  %v1131_v0 = vadd.f32 %v1954_v62, %v1843_v56 }
 0x398   : > { %1962 = vmatpush3.bf16.msra.mxu0 %v2112_v60 }
 0x399   : > { %v1916_v1 = vpack.c.bf16 %v1134_v63, %v1134_v63  ;;  %v1135_v3 = vmax.f32 %v1131_v0, 0.0  ;;  %v2113_v63 = vld [vmem:[%s2743_s5 + $0x60] sm:$0xff]  }
 0x39a   : > { %1963 = vmatprep.subr.bf16.mxu0 %v2113_v63 }
 0x39b   : > { %1145 = vst.msk [vmem:[%s2543_s25] sm:$0xf] %vm1144_vm7, %v1916_v1  ;;  %v1148_v4 = vshrl.u32 %v1916_v1, 16  ;;  %v1151_v5 = vshll.u32 %v1916_v1, 16  ;;  %v1917_v6 = vpack.c.bf16 %v1135_v3, %v1135_v3 }
 0x39d   : > { %v1150_v2 = vrot.slane %v1148_v4, 7  ;;  %v1161_v7 = vrot.slane %v1148_v4, 5  ;;  %v1162_v8 = vrot.slane %v1151_v5, 6  ;;  %1146 = vst.msk [vmem:[%s2543_s25 + $0x4] sm:$0xf] %vm1144_vm7, %v1917_v6  ;;  %v1171_v9 = vshrl.u32 %v1917_v6, 16 }
 0x39e   : > { %v1174_v12 = vshll.u32 %v1917_v6, 16  ;;  %v2114_v4 = vld [vmem:[%s2743_s5 + $0x20] sm:$0xff]  }
 0x39f   : > { %v1153_v13 = vor.u32 %v1151_v5, %v1150_v2  ;;  %v1163_v14 = vor.u32 %v1162_v8, %v1161_v7  ;;  %v1173_v15 = vrot.slane %v1171_v9, 7  ;;  %v1182_v16 = vrot.slane %v1171_v9, 5  ;;  %v2115_v2 = vld [vmem:[%s2743_s5 + $0x68] sm:$0xff]   ;;  %1964 = vmatpush3.bf16.msra.mxu0 %v2114_v4 }
 0x3a0   : > { %v1183_v19 = vrot.slane %v1174_v12, 6  ;;  %v2116_v9 = vld [vmem:[%s2743_s5 + $0x28] sm:$0xff]   ;;  %1965 = vmatprep.subr.bf16.mxu0 %v2115_v2 }
 0x3a1   : > { %v1159_v20 = vsel %vm2549_vm8, %v1153_v13, %v1158_v11  ;;  %v1164_v21 = vrot.slane %v1163_v14, 4  ;;  %v1176_v22 = vor.u32 %v1174_v12, %v1173_v15  ;;  %v2117_v12 = vld [vmem:[%s2743_s5 + $0x70] sm:$0xff]  }
 0x3a2   : > { %1160 = vst [vmem:[#allocation3 + $0x4] sm:$0x7] %v1159_v20  ;;  %v1184_v23 = vor.u32 %v1183_v19, %v1182_v16  ;;  %v2118_v15 = vld [vmem:[%s2743_s5 + $0x30] sm:$0xff]   ;;  %v2120_v19 = vld [vmem:[%s2743_s5 + $0x38] sm:$0xff]  }
 0x3a3   : > { %v1168_v24 = vsel %vm2549_vm8, %v1164_v21, %v1167_v17  ;;  %v1180_v25 = vsel %vm2549_vm8, %v1176_v22, %v1179_v18  ;;  %1966 = vmatpush3.bf16.msra.mxu0 %v2116_v9  ;;  %v2119_v17 = vld [vmem:[%s2743_s5 + $0x78] sm:$0xff]  }
 0x3a4   : > { %1169 = vst [vmem:[#allocation3 + $0x8] sm:$0x7] %v1168_v24  ;;  %1181 = vst [vmem:[#allocation3 + $0xc] sm:$0x7] %v1180_v25  ;;  %v1185_v27 = vrot.slane %v1184_v23, 4  ;;  %1967 = vmatprep.subr.bf16.mxu0 %v2117_v12  ;;  %v1217_v23 = vpop.permute.xlu0 %1216  ;;  %v1211_v24 = vpop.permute.xlu1 %1210 }
 0x3a5   : > { %v1263_v63 = vsel %vm1260_vm9, %v1191_v52, %v1211_v24 }
 0x3a6   : > { %v1189_v28 = vsel %vm2549_vm8, %v1185_v27, %v1188_v26  ;;  %v1265_v9 = vsel %vm876_vm4, %v1263_v63, %v1217_v23 }
 0x3a7   : > { %1190 = vst [vmem:[#allocation3 + $0x10] sm:$0x7] %v1189_v28  ;;  %1968 = vmatpush3.bf16.msra.mxu0 %v2118_v15 }
 0x3a8   : > { %1969 = vmatprep.subr.bf16.mxu0 %v2119_v17  ;;  %v1396_v25 = vpop.permute.xlu0 %1395  ;;  %v1384_v26 = vpop.permute.xlu1 %1383 }
 0x3a9   : > { %v2091_v31 = vld [vmem:[#allocation3 + $0x4] ss:$0 sps:$4 sm:$0x66]  }
 0x3aa   : > { %v1236_v33 = vrot.slane %v2091_v31, 1  ;;  %v2100_v48 = vld [vmem:[#allocation3 + $0x4] ss:$0 sps:$4 sm:$0x77]  }
 0x3ab   : > { %v2567_v32 = vld [vmem:[#allocation3 + $0xc] sm:$0x3]  ;;  %v2569_v34 = vld [vmem:[#allocation3 + $0x8] sm:$0x3]  ;;  %v1229_v54 = vshll.u32 %v2100_v48, 16  ;;  %v1227_v0 = vshrl.u32 %v2100_v48, 16  ;;  %1970 = vmatpush3.bf16.msra.mxu0 %v2120_v19 }
 0x3ac   : > { %v1870_v36 = vcombine.low %v2567_v32, %v2567_v32  ;;  %v2095_v37 = vld [vmem:[#allocation3 + $0x8] ss:$0 sps:$4 sm:$0x66]   ;;  %1281 = vrot.lane.b32.xlu0 %v1236_v33, %s2194_s19  ;;  %v2096_v38 = vld [vmem:[#allocation3 + $0xc] ss:$0 sps:$4 sm:$0x66]   ;;  %v1867_v40 = vcombine.low %v2569_v34, %v2569_v34 }
 0x3ad   : > { %v1307_v41 = vrot.slane %v2096_v38, 1  ;;  %v1259_v43 = vrot.slane %v2095_v37, 1  ;;  %v2101_v56 = vld [vmem:[#allocation3 + $0xc] ss:$0 sps:$4 sm:$0x77]   ;;  %v1231_v58 = vrot.slane %v1229_v54, 1 }
 0x3ae   : > { %1290 = vrot.lane.b32.xlu1 %v1870_v36, %s2194_s19  ;;  %v2097_v39 = vld [vmem:[#allocation3 + $0x10] ss:$0 sps:$4 sm:$0x66]   ;;  %v2102_v59 = vld [vmem:[#allocation3 + $0x8] ss:$0 sps:$4 sm:$0x77]  }
 0x3af   : > { %v1353_v42 = vrot.slane %v2097_v39, 1  ;;  %v1419_v44 = vrot.slane %v1307_v41, 6  ;;  %v2099_v61 = vld [vmem:[#allocation3 + $0x10] ss:$0 sps:$4 sm:$0x33]   ;;  %v1298_v62 = vshll.u32 %v2101_v56, 16  ;;  %v2610_v1 = vor.u32 %v1231_v58, %v1227_v0 }
 0x3b0   : > { %1242 = vrot.lane.b32.xlu0 %v1867_v40, %s2194_s19  ;;  %v1250_v3 = vshll.u32 %v2102_v59, 16  ;;  %v2103_v6 = vld [vmem:[#allocation3 + $0x10] ss:$0 sps:$4 sm:$0x77]   ;;  %v1296_v7 = vshrl.u32 %v2101_v56, 16  ;;  %v1248_v13 = vshrl.u32 %v2102_v59, 16 }
 0x3b1   : > { %v1424_v46 = vrot.slane %v1353_v42, 4  ;;  %v1436_v47 = vsel %vm549_vm0, %v1259_v43, %v1419_v44  ;;  %v1300_v5 = vrot.slane %v1298_v62, 1  ;;  %v1344_v11 = vshll.u32 %v2103_v6, 16  ;;  %v1194_v21 = vld [vmem:[#allocation3 + $0x4] sm:$0x3] }
 0x3b2   : > { %1237 = vrot.lane.b32.xlu1 %v1236_v33, %s2193_s26  ;;  %v1252_v8 = vrot.slane %v1250_v3, 1  ;;  %v1342_v18 = vshrl.u32 %v2103_v6, 16  ;;  %v1864_v22 = vcombine.low %v1194_v21, %v1194_v21 }
 0x3b3   : > { %v1442_v50 = vsel %vm553_vm1, %v1436_v47, %v1424_v46  ;;  %v1301_v10 = vor.u32 %v1300_v5, %v1296_v7  ;;  %v1346_v16 = vrot.slane %v1344_v11, 1 }
 0x3b4   : > { %v1450_v53 = vsel %vm555_vm2, %v1442_v50, %v1879_v45  ;;  %1329 = vrot.lane.b32.xlu0 %v1870_v36, %s2197_s13  ;;  %v1253_v14 = vor.u32 %v1252_v8, %v1248_v13 }
 0x3b5   : > { %1999 = vmatmul.mubr.msk.bf16.vlgmr.msra.gmra.mrb[4].mxu1 %vm1260_vm9, %v1450_v53  ;;  %v1347_v20 = vor.u32 %v1346_v16, %v1342_v18 }
 0x3b6   : > { %1283 = vrot.lane.b32.xlu1 %v1867_v40, %s2197_s13 }
 0x3b8   : > { %1331 = vrot.lane.b32.xlu0 %v1307_v41, %s2193_s26 }
 0x3ba   : > { %1285 = vrot.lane.b32.xlu1 %v1259_v43, %s2193_s26 }
 0x3bc   : > { %1327 = vrot.lane.b32.xlu0 %v1259_v43, %s2194_s19 }
 0x3be   : > { %1336 = vrot.lane.b32.xlu1 %v2099_v61, %s2194_s19 }
 0x3c0   : > { %1279 = vrot.lane.b32.xlu0 %v2610_v1, %s2193_s26 }
 0x3c2   : > { %1374 = vrot.lane.b32.xlu1 %v1307_v41, %s2194_s19 }
 0x3c4   : > { %1378 = vrot.lane.b32.xlu0 %v1353_v42, %s2193_s26 }
 0x3c6   : > { %1302 = vrot.lane.b32.xlu1 %v1301_v10, %s2197_s13 }
 0x3c8   : > { %1325 = vrot.lane.b32.xlu0 %v1253_v14, %s2193_s26 }
 0x3ca   : > { %1254 = vrot.lane.b32.xlu1 %v1253_v14, %s2197_s13 }
 0x3cc   : > { %1372 = vrot.lane.b32.xlu0 %v1301_v10, %s2193_s26  ;;  %s1920_s26 = sshll.u32 %s2267_s9, 7  ;;  %s2199_s9 = smov [#allocation4]  }
 0x3cd   : > { %s2681_s23 = scalar_lea.hbm %s2745_s7, %s1920_s26  ;;  %s2125_s18 = sshll.u32 %s2199_s9, 4  ;;  %s2126_s18 = int_to_ptr.vmem [resolvable:$false] %s2125_s18 }
 0x3ce   : > { %1348 = vrot.lane.b32.xlu1 %v1347_v20, %s2197_s13  ;;  %s2127_s20 = scalar_lea.vmem %s2126_s18, 256  ;;  %p2128_p0 = scmp.lt.s32.totalorder %s2684_s24, %s2126_s18 }
 0x3cf   : > { %p2129_p1 = scmp.lt.s32.totalorder %s2127_s20, %s2121_s12 }
 0x3d0   : > { %1376 = vrot.lane.b32.xlu0 %v2099_v61, %s2197_s13 }
 0x3d1   : > { %p2130_p2 = por %p2129_p1, %p2128_p0 }
 0x3d2   : > { %1221 = vrot.lane.b32.xlu1 %v1864_v22, %s2197_s13 }
 0x3d3   : > { %p2131_p3 = pnand %p2130_p2, %p2124_p13 }
 0x41e   : > { %v1282_v27 = vpop.permute.xlu0 %1281 }
 0x420   : > { %v1291_v28 = vpop.permute.xlu1 %1290 }
 0x422   : > { %v1243_v29 = vpop.permute.xlu0 %1242 }
 0x424   : > { %v1238_v30 = vpop.permute.xlu1 %1237 }
 0x425   : > { %v1271_v47 = vsel %vm1260_vm9, %v2610_v1, %v1238_v30 }
 0x426   : > { %v1330_v31 = vpop.permute.xlu0 %1329  ;;  %v1273_v55 = vsel %vm876_vm4, %v1271_v47, %v1243_v29 }
 0x428   : > { %v1284_v33 = vpop.permute.xlu1 %1283 }
 0x42a   : > { %v1332_v35 = vpop.permute.xlu0 %1331 }
 0x42b   : > { %v1363_v56 = vsel %vm1260_vm9, %v1301_v10, %v1332_v35 }
 0x42c   : > { %v1286_v36 = vpop.permute.xlu1 %1285 }
 0x42d   : > { %v1317_v43 = vsel %vm1260_vm9, %v1253_v14, %v1286_v36 }
 0x42e   : > { %v1328_v37 = vpop.permute.xlu0 %1327  ;;  %v1319_v50 = vsel %vm876_vm4, %v1317_v43, %v1291_v28 }
 0x430   : > { %v1337_v38 = vpop.permute.xlu1 %1336 }
 0x431   : > { %v1365_v59 = vsel %vm876_vm4, %v1363_v56, %v1337_v38 }
 0x432   : > { %v1280_v39 = vpop.permute.xlu0 %1279 }
 0x433   : > { %v1310_v45 = vsel %vm1260_vm9, %v1194_v21, %v1280_v39 }
 0x434   : > { %v1375_v40 = vpop.permute.xlu1 %1374  ;;  %v1312_v53 = vsel %vm876_vm4, %v1310_v45, %v1282_v27 }
 0x435   : > { %v1314_v0 = vsel %vm1266_vm10, %v1312_v53, %v1284_v33 }
 0x436   : > { %v1379_v41 = vpop.permute.xlu0 %1378  ;;  %v1417_v10 = vrot.slane %v1314_v0, 6 }
 0x437   : > { %v1410_v44 = vsel %vm1260_vm9, %v1347_v20, %v1379_v41 }
 0x438   : > { %v1303_v42 = vpop.permute.xlu1 %1302  ;;  %v1412_v51 = vsel %vm876_vm4, %v1410_v44, %v1384_v26 }
 0x439   : > { %v1321_v54 = vsel %vm1266_vm10, %v1319_v50, %v1303_v42 }
 0x43a   : > { %v1326_v46 = vpop.permute.xlu0 %1325  ;;  %v1418_v1 = vrot.slane %v1321_v54, 6 }
 0x43b   : > { %v1356_v49 = vsel %vm1260_vm9, %v2569_v34, %v1326_v46  ;;  %v1414_v34 = vsel %vm1266_vm10, %v1412_v51, %v1396_v25 }
 0x43c   : > { %v1255_v48 = vpop.permute.xlu1 %1254  ;;  %v1358_v57 = vsel %vm876_vm4, %v1356_v49, %v1328_v37  ;;  %v1428_v8 = vrot.slane %v1414_v34, 2 }
 0x43d   : > { %v1275_v60 = vsel %vm1266_vm10, %v1273_v55, %v1255_v48  ;;  %v1360_v4 = vsel %vm1266_vm10, %v1358_v57, %v1330_v31 }
 0x43e   : > { %v1373_v58 = vpop.permute.xlu0 %1372  ;;  %v1433_v6 = vsel %vm549_vm0, %v1275_v60, %v1418_v1  ;;  %v1422_v13 = vrot.slane %v1360_v4, 4 }
 0x43f   : > { %v1403_v62 = vsel %vm1260_vm9, %v2567_v32, %v1373_v58 }
 0x440   : > { %v1349_v61 = vpop.permute.xlu1 %1348  ;;  %v1405_v2 = vsel %vm876_vm4, %v1403_v62, %v1375_v40 }
 0x441   : > { %v1367_v3 = vsel %vm1266_vm10, %v1365_v59, %v1349_v61 }
 0x442   : > { %v1423_v5 = vrot.slane %v1367_v3, 4  ;;  %v1377_v7 = vpop.permute.xlu0 %1376 }
 0x443   : > { %v1407_v11 = vsel %vm1266_vm10, %v1405_v2, %v1377_v7 }
 0x444   : > { %v1222_v32 = vpop.permute.xlu1 %1221  ;;  %v1440_v12 = vsel %vm553_vm1, %v1433_v6, %v1423_v5  ;;  %v1427_v15 = vrot.slane %v1407_v11, 2 }
 0x445   : > { %v1268_v14 = vsel %vm1266_vm10, %v1265_v9, %v1222_v32  ;;  %v1447_v16 = vsel %vm555_vm2, %v1440_v12, %v1428_v8 }
 0x446   : > { %v1431_v17 = vsel %vm549_vm0, %v1268_v14, %v1417_v10  ;;  %1636 = vmatprep.mubr.bf16.mxu0 %v1447_v16 }
 0x447   : > { %v1438_v18 = vsel %vm553_vm1, %v1431_v17, %v1422_v13 }
 0x448   : > { %v1444_v19 = vsel %vm555_vm2, %v1438_v18, %v1427_v15 }
 0x449   : > { %1637 = vmatmul.mubr.bf16.vlgmr.msra.gmra.mrb[8].mxu0 %v1444_v19 }
 0x488   : > { %v1679_v20 = vpop.f32.mrb[4].mxu1 }
 0x489   : > { %v2000_v21 = vpop.f32.mrb[5].mxu1 }
 0x48a   : > { %v1682_v22 = vpop.f32.mrb[6].mxu1 }
 0x48b   : > { %v2001_v23 = vpop.f32.mrb[7].mxu1 }
 0x48c   : > { %2134 = shalt.err (!%p2131_p3)
}
 0x48d   : > { %s2135_s22 = scalar_lea.hbm %s2681_s23, 128  ;;  %s2139_s13 = scalar_lea.hbm %s2745_s7, 256 }
 0x48e   : > { %p2136_p4 = scmp.ne.s32.totalorder %s2681_s23, %s2135_s22  ;;  %p2140_p9 = scmp.lt.u32.totalorder %s2681_s23, %s2745_s7 }
 0x48f   : > { %p2141_p10 = scmp.lt.u32.totalorder %s2139_s13, %s2135_s22  ;;  %p2143_p12 = scmp.lt.u32.totalorder %s2135_s22, %s2681_s23 }
 0x490   : > { %p2137_p7 = pnand %p2136_p4, %p2284_p5 }
 0x491   : > { %p2142_p11 = por %p2141_p10, %p2140_p9 }
 0x492   : > { %p2138_p8 = pneg %p2137_p7 }
 0x493   : > { %p2144_p13 = por %p2143_p12, %p2142_p11 }
 0x495   : > { %p2145_p0 = pnand %p2144_p13, %p2138_p8 }
 0x497   : > { %2148 = shalt.err (!%p2145_p0)
}
 0x498   : > { %s2200_s12 = smov 4   ;;  %v1880_v25 = vld [vmem:[%s2744_s6] ss:$0 sm:$0xff]  ;;  %s1907_s15 = sshll.u32 %s2296_s17, 3 }
 0x499   : > { %2003 = dma.vmem_to_hbm [thread:$0]  (%p2284_p5), %s2684_s24, 128, %s2681_s23, %s2688_s10, %s2194_s19, %s2194_s19, %s2200_s12  }
 0x49a   : > { %s316_s26 = scalar_lea.vmem %s2746_s8, %s1907_s15 }
 0x51c   : > { %v1971_v24 = vpop.f32.mrb[8].mxu0 }
 0x51d   : > { %v1972_v26 = vpop.f32.mrb[9].mxu0 }
 0x51e   : > { %v1973_v27 = vadd.f32 %v1972_v26, %v1971_v24  ;;  %v1974_v28 = vpop.f32.mrb[10].mxu0 }
 0x51f   : > { %v1975_v29 = vpop.f32.mrb[11].mxu0 }
 0x520   : > { %v1639_v30 = vadd.f32 %v1973_v27, %v1880_v25  ;;  %v1976_v31 = vadd.f32 %v1975_v29, %v1974_v28 }
 0x522   : > { %v1680_v33 = vadd.f32 %v1679_v20, %v1639_v30  ;;  %v1642_v35 = vadd.f32 %v1976_v31, %v1880_v25 }
 0x524   : > { %v1683_v36 = vadd.f32 %v1682_v22, %v1642_v35 }
 0x526   : > { %v1924_v37 = vpack.c.bf16 %v1683_v36, %v1680_v33 }
 0x528   : > { %1925 = vst [vmem:[%s316_s26] sm:$0xff] %v1924_v37  }
 0x529 PF: > { %p2009_p5 = scmp.ge.s32.totalorder %s2183_s30, 2  ;;  %s1733_s19 = sand.u32 1, %s2171_s27  }
 0x52a   : > { %s1734_s23 = scalar_lea.sflag [#allocation5], %s1733_s19 }
 0x52b   : > { %p2006_p1 = pnand %p2009_p5, %p2288_p6 }
 0x52d   : > { %2166 = dma.done.wait (!%p2006_p1), %s1734_s23, 128  }
 0x52e   : > { %2168 = vsyncadd (!%p2006_p1), %s1734_s23, 4294967168  ;;  %p19_p2 = scmp.ge.s32.totalorder %s2271_s11, 4   ;;  %s2757_s27 = smov %s2175_s28 }
 0x52f   : > { %s2758_s28 = smov %s2179_s29  ;;  %s2759_s29 = smov %s2282_s14 }
 0x530   : > { %s2760_s30 = smov %s2271_s11  ;;  %21 = sbr.rel (!%p19_p2) target bundleno = 3 (0x3), region = 104 }
 0x537   :  { %1747 = vsyncpa [#allocation5], 1 }
 0x538   :  { %1749 = vsyncpa [#allocation5 + $0x1], 1 }

</bundles_post_ra>
